<compile_context>
chip_gen: v7x
topology: tpu7x:2x2x1
jax: 0.10.0
libtpu: 0.0.40
codegen_flags: <defaults>
</compile_context>

<pallas_src>
import jax
import jax.numpy as jnp
import numpy as np
from jax import lax
from jax.experimental import pallas as pl
from jax.experimental.pallas import tpu as pltpu


# ----------------------------------------------------------------------------
# Fused Pallas kernel (all LSTM layers + FC head)
# ----------------------------------------------------------------------------
def _make_fused_lstm_kernel(num_layers, B, T):
    """Build the fused kernel body for a fixed (num_layers, B, T)."""

    def kernel(*refs):
        # ---- unpack refs: x, per-layer (w_ih, w_hh, bias), fc_w, fc_b, out ----
        x_ref = refs[0]                                            # [T*B, D] time-major f32
        layer_refs = [
            (refs[1 + 3 * l], refs[2 + 3 * l], refs[3 + 3 * l])    # ([D_in,4H], [H,4H], [1,4H])
            for l in range(num_layers)
        ]
        fc_w_ref = refs[1 + 3 * num_layers]                        # [H, O]
        fc_b_ref = refs[2 + 3 * num_layers]                        # [1, O]
        out_ref = refs[3 + 3 * num_layers]                         # [B, O]

        f32 = jnp.float32
        bf16 = jnp.bfloat16
        H = layer_refs[0][1].shape[0]

        # Loop-invariant weights: loaded exactly once (values reused below).
        w_ih = [wr[...] for (wr, _, _) in layer_refs]              # bf16 [D_in, 4H]
        w_hh = [hr[...] for (_, hr, _) in layer_refs]              # bf16 [H, 4H]
        bias = [br[...] for (_, _, br) in layer_refs]              # f32  [1, 4H]
        # Pre-broadcast per-step bias rows once (JAX does not CSE broadcast_in_dim).
        bias_rows = [None] + [
            jnp.broadcast_to(bias[l], (B, 4 * H)) for l in range(1, num_layers)
        ]

        # Hoisted (non-recurrent) layer-0 input projection over ALL timesteps:
        # one [T*B, D] @ [D, 4H] bf16 matmul, f32 accumulation, bias folded in.
        gx0 = jnp.dot(x_ref[...].astype(bf16), w_ih[0],
                      preferred_element_type=f32) + bias[0]        # [T*B, 4H] f32

        def lstm_cell(pre, c):
            # pre: [B, 4H] f32 fused pre-activation, gate order (i, f, o, g).
            ifo = jax.nn.sigmoid(pre[:, :3 * H])                   # 1 EUP pass over 3H lanes
            g = jnp.tanh(pre[:, 3 * H:])                           # 1 EUP pass over H lanes
            i_g = ifo[:, :H]
            f_g = ifo[:, H:2 * H]
            o_g = ifo[:, 2 * H:]
            c_new = f_g * c + i_g * g                              # f32 elementwise (v5e-safe)
            h_new = o_g * jnp.tanh(c_new)
            return h_new, c_new

        # Wavefront over (layer, time): wave w runs layer l at t = w - l, so
        # (layer 0, t) and (layer 1, t-1) are independent within one wave and
        # their matmul/EUP latency can overlap.
        h = [jnp.zeros((B, H), f32) for _ in range(num_layers)]
        c = [jnp.zeros((B, H), f32) for _ in range(num_layers)]
        pending = [None] * num_layers        # pending[l] = most recent h_{l, t}

        for wave in range(T + num_layers - 1):                     # statically unrolled (small)
            prev_pending = list(pending)                           # snapshot: previous wave
            for l in range(num_layers):
                t = wave - l
                if t < 0 or t >= T:
                    continue
                if l == 0:
                    pre = gx0[t * B:(t + 1) * B, :]                # hoisted projection slice
                else:
                    # per-step input projection from layer l-1's output of step t
                    pre = jnp.dot(prev_pending[l - 1].astype(bf16), w_ih[l],
                                  preferred_element_type=f32) + bias_rows[l]
                if t > 0:                                          # h0 == 0: skip matmul at t=0
                    pre = pre + jnp.dot(h[l].astype(bf16), w_hh[l],
                                        preferred_element_type=f32)
                h[l], c[l] = lstm_cell(pre, c[l])
                pending[l] = h[l]

        # Final Linear head (kept f32; tiny, off the recurrence).
        out_ref[...] = (
            jnp.dot(h[num_layers - 1], fc_w_ref[...], preferred_element_type=f32)
            + fc_b_ref[...]
        )

    return kernel


# ----------------------------------------------------------------------------
# Wrapper
# ----------------------------------------------------------------------------
@jax.jit
def lstm_model_forward(x, params):
    """Matches LSTMModel.forward: x [B, T, num_features] -> [B, output_size]."""
    layers = params["lstm_layers"]
    num_layers = len(layers)
    B, T, D = x.shape
    H = layers[0][1].shape[0]
    O = params["fc_w"].shape[-1]

    # Time-major [T*B, D] rows so each timestep is a contiguous [B, D] slab.
    # 256-byte array: the XLA transpose is ~free (replaces in-kernel row copies).
    x2d = jnp.transpose(x, (1, 0, 2)).reshape(T * B, D).astype(jnp.float32)

    args = [x2d]
    in_specs = [pl.BlockSpec((T * B, D), lambda i: (0, 0))]
    for (w_ih, w_hh, b) in layers:
        args += [w_ih, w_hh, b]
        in_specs += [
            pl.BlockSpec(w_ih.shape, lambda i: (0, 0)),
            pl.BlockSpec(w_hh.shape, lambda i: (0, 0)),
            pl.BlockSpec(b.shape, lambda i: (0, 0)),
        ]
    args += [params["fc_w"], params["fc_b"]]
    in_specs += [
        pl.BlockSpec(params["fc_w"].shape, lambda i: (0, 0)),
        pl.BlockSpec(params["fc_b"].shape, lambda i: (0, 0)),
    ]

    kernel = _make_fused_lstm_kernel(num_layers, B, T)
    return pl.pallas_call(
        kernel,
        out_shape=jax.ShapeDtypeStruct((B, O), jnp.float32),
        grid_spec=pltpu.PrefetchScalarGridSpec(
            num_scalar_prefetch=0,
            grid=(1,),                     # single step: whole model in one invocation
            in_specs=in_specs,
            out_specs=pl.BlockSpec((B, O), lambda i: (0, 0)),
        ),
        compiler_params=pltpu.CompilerParams(
            dimension_semantics=("arbitrary",),
        ),
    )(*args)


# ----------------------------------------------------------------------------
# Deterministic parameter init (PyTorch-style uniform(-1/sqrt(H), 1/sqrt(H)))
# Fused, transposed layout relative to PyTorch:
#   w_ih: [D_in, 4H] bf16,  w_hh: [H, 4H] bf16,  bias (b_ih + b_hh): [1, 4H] f32
# Gate order: i, f, o, g (reordered from PyTorch's i,f,g,o so the three sigmoid
# gates form one contiguous [.., :3H] lane block).
# ----------------------------------------------------------------------------
def init_params(key, input_size, hidden_size, num_layers, output_size):
    k = 1.0 / np.sqrt(hidden_size)
    H = hidden_size
    layers = []
    for layer in range(num_layers):
        d_in = input_size if layer == 0 else hidden_size
        key, k1, k2, k3, k4 = jax.random.split(key, 5)
        w_ih = jax.random.uniform(k1, (d_in, 4 * H), jnp.float32, -k, k)
        w_hh = jax.random.uniform(k2, (H, 4 * H), jnp.float32, -k, k)
        b_ih = jax.random.uniform(k3, (1, 4 * H), jnp.float32, -k, k)
        b_hh = jax.random.uniform(k4, (1, 4 * H), jnp.float32, -k, k)
        layers.append((w_ih.astype(jnp.bfloat16),      # MXU operand -> bf16
                       w_hh.astype(jnp.bfloat16),      # MXU operand -> bf16
                       b_ih + b_hh))                   # bias stays f32
    key, k5, k6 = jax.random.split(key, 3)
    fc_w = jax.random.uniform(k5, (hidden_size, output_size), jnp.float32, -k, k)
    fc_b = jax.random.uniform(k6, (1, output_size), jnp.float32, -k, k)
    return {"lstm_layers": tuple(layers), "fc_w": fc_w, "fc_b": fc_b}


# ----------------------------------------------------------------------------
# Pure-JAX reference (PyTorch-faithful full-f32 math; same fused param layout)
# ----------------------------------------------------------------------------
def reference_forward(x, params):
    B, T, D = x.shape
    H = params["lstm_layers"][0][1].shape[0]
    cur = x.astype(jnp.float32)
    for (w_ih, w_hh, b) in params["lstm_layers"]:
        w_ih = w_ih.astype(jnp.float32)
        w_hh = w_hh.astype(jnp.float32)

        def step(carry, x_t, w_ih=w_ih, w_hh=w_hh, b=b):
            h, c = carry
            pre = x_t @ w_ih + h @ w_hh + b                 # [B, 4H], order i,f,o,g
            i = jax.nn.sigmoid(pre[:, 0 * H:1 * H])
            f = jax.nn.sigmoid(pre[:, 1 * H:2 * H])
            o = jax.nn.sigmoid(pre[:, 2 * H:3 * H])
            g = jnp.tanh(pre[:, 3 * H:4 * H])
            c = f * c + i * g
            h = o * jnp.tanh(c)
            return (h, c), h

        h0 = jnp.zeros((B, H), jnp.float32)
        c0 = jnp.zeros((B, H), jnp.float32)
        _, hs = lax.scan(step, (h0, c0), jnp.transpose(cur, (1, 0, 2)))
        cur = jnp.transpose(hs, (1, 0, 2))
    last = cur[:, -1, :]
    return last @ params["fc_w"] + params["fc_b"]


# ----------------------------------------------------------------------------
if __name__ == "__main__":
    # Small shapes implied by the module's config params
    batch = 2
    seq_len = 8
    num_features = 4      # input_size
    hidden_size = 32      # 4H = 128 -> one full vreg lane width per fused gate block
    num_layers = 2
    output_size = 4       # output_shape

    key = jax.random.PRNGKey(0)
    key, xk, pk = jax.random.split(key, 3)
    x = jax.random.normal(xk, (batch, seq_len, num_features), jnp.float32)
    params = init_params(pk, num_features, hidden_size, num_layers, output_size)

    out = lstm_model_forward(x, params)
    out = jax.block_until_ready(out)

    # Reference is full f32; kernel uses bf16 MXU operands with f32 accumulation,
    # so compare with a tolerance that covers the bf16 operand rounding.
    ref = reference_forward(x, params)
    np.testing.assert_allclose(np.asarray(out), np.asarray(ref), rtol=2e-2, atol=2e-2)
    assert out.shape == (batch, output_size)

    print("KERNEL_OK")
</pallas_src>

<mosaic_0001>
module attributes {stable_mosaic.version = 11 : i64} {
  func.func @kernel(%arg0: i32, %arg1: memref<16x4xf32, #tpu.memory_space<vmem>>, %arg2: memref<4x128xbf16, #tpu.memory_space<vmem>>, %arg3: memref<32x128xbf16, #tpu.memory_space<vmem>>, %arg4: memref<1x128xf32, #tpu.memory_space<vmem>>, %arg5: memref<32x128xbf16, #tpu.memory_space<vmem>>, %arg6: memref<32x128xbf16, #tpu.memory_space<vmem>>, %arg7: memref<1x128xf32, #tpu.memory_space<vmem>>, %arg8: memref<32x4xf32, #tpu.memory_space<vmem>>, %arg9: memref<1x4xf32, #tpu.memory_space<vmem>>, %arg10: memref<2x4xf32, #tpu.memory_space<vmem>>) attributes {dimension_semantics = [#tpu.dimension_semantics<arbitrary>], iteration_bounds = array<i64: 1>, scalar_prefetch = 0 : i64, scratch_operands = 0 : i64, tpu.core_type = #tpu.core_type<tc>, window_params = [{pipeline_mode = #tpu.pipeline_mode<synchronous>, transform_indices = @transform_0, window_bounds = array<i64: 16, 4>}, {pipeline_mode = #tpu.pipeline_mode<synchronous>, transform_indices = @transform_1, window_bounds = array<i64: 4, 128>}, {pipeline_mode = #tpu.pipeline_mode<synchronous>, transform_indices = @transform_2, window_bounds = array<i64: 32, 128>}, {pipeline_mode = #tpu.pipeline_mode<synchronous>, transform_indices = @transform_3, window_bounds = array<i64: 1, 128>}, {pipeline_mode = #tpu.pipeline_mode<synchronous>, transform_indices = @transform_4, window_bounds = array<i64: 32, 128>}, {pipeline_mode = #tpu.pipeline_mode<synchronous>, transform_indices = @transform_5, window_bounds = array<i64: 32, 128>}, {pipeline_mode = #tpu.pipeline_mode<synchronous>, transform_indices = @transform_6, window_bounds = array<i64: 1, 128>}, {pipeline_mode = #tpu.pipeline_mode<synchronous>, transform_indices = @transform_7, window_bounds = array<i64: 32, 4>}, {pipeline_mode = #tpu.pipeline_mode<synchronous>, transform_indices = @transform_8, window_bounds = array<i64: 1, 4>}, {pipeline_mode = #tpu.pipeline_mode<synchronous>, transform_indices = @transform_9, window_bounds = array<i64: 2, 4>}]} {
    %c0 = arith.constant 0 : index
    %c0_0 = arith.constant 0 : index
    %0 = vector.load %arg2[%c0, %c0_0] : memref<4x128xbf16, #tpu.memory_space<vmem>>, vector<4x128xbf16>
    %c0_1 = arith.constant 0 : index
    %c0_2 = arith.constant 0 : index
    %1 = vector.load %arg5[%c0_1, %c0_2] : memref<32x128xbf16, #tpu.memory_space<vmem>>, vector<32x128xbf16>
    %c0_3 = arith.constant 0 : index
    %c0_4 = arith.constant 0 : index
    %2 = vector.load %arg3[%c0_3, %c0_4] : memref<32x128xbf16, #tpu.memory_space<vmem>>, vector<32x128xbf16>
    %c0_5 = arith.constant 0 : index
    %c0_6 = arith.constant 0 : index
    %3 = vector.load %arg6[%c0_5, %c0_6] : memref<32x128xbf16, #tpu.memory_space<vmem>>, vector<32x128xbf16>
    %c0_7 = arith.constant 0 : index
    %c0_8 = arith.constant 0 : index
    %4 = vector.load %arg4[%c0_7, %c0_8] : memref<1x128xf32, #tpu.memory_space<vmem>>, vector<1x128xf32>
    %c0_9 = arith.constant 0 : index
    %c0_10 = arith.constant 0 : index
    %5 = vector.load %arg7[%c0_9, %c0_10] : memref<1x128xf32, #tpu.memory_space<vmem>>, vector<1x128xf32>
    %6 = vector.shape_cast %5 : vector<1x128xf32> to vector<1x128xf32>
    %7 = vector.broadcast %6 : vector<1x128xf32> to vector<2x128xf32>
    %c0_11 = arith.constant 0 : index
    %c0_12 = arith.constant 0 : index
    %8 = vector.load %arg1[%c0_11, %c0_12] : memref<16x4xf32, #tpu.memory_space<vmem>>, vector<16x4xf32>
    %9 = arith.truncf %8 : vector<16x4xf32> to vector<16x4xbf16>
    %cst = arith.constant dense<0.000000e+00> : vector<16x128xf32>
    %10 = tpu.matmul %9, %0, %cst {dimension_numbers = #tpu.dot_dimension_numbers<[1], [0], [0], [1], [0, 0, 1, 1], [], []>} : vector<16x4xbf16>, vector<4x128xbf16>, vector<16x128xf32> -> vector<16x128xf32>
    %11 = vector.broadcast %4 : vector<1x128xf32> to vector<16x128xf32>
    %12 = arith.addf %10, %11 : vector<16x128xf32>
    %cst_13 = arith.constant 0.000000e+00 : f32
    %13 = vector.broadcast %cst_13 : f32 to vector<2x32xf32>
    %cst_14 = arith.constant 0.000000e+00 : f32
    %14 = vector.broadcast %cst_14 : f32 to vector<2x32xf32>
    %15 = vector.extract_strided_slice %12 {offsets = [0, 0], sizes = [2, 128], strides = [1, 1]} : vector<16x128xf32> to vector<2x128xf32>
    %16 = vector.extract_strided_slice %15 {offsets = [0, 0], sizes = [2, 96], strides = [1, 1]} : vector<2x128xf32> to vector<2x96xf32>
    %17 = arith.negf %16 : vector<2x96xf32>
    %18 = math.exp %17 : vector<2x96xf32>
    %cst_15 = arith.constant 1.000000e+00 : f32
    %19 = vector.broadcast %cst_15 : f32 to vector<2x96xf32>
    %20 = arith.addf %19, %18 : vector<2x96xf32>
    %21 = arith.divf %19, %20 : vector<2x96xf32>
    %22 = vector.extract_strided_slice %15 {offsets = [0, 96], sizes = [2, 32], strides = [1, 1]} : vector<2x128xf32> to vector<2x32xf32>
    %23 = math.tanh %22 : vector<2x32xf32>
    %24 = vector.extract_strided_slice %21 {offsets = [0, 0], sizes = [2, 32], strides = [1, 1]} : vector<2x96xf32> to vector<2x32xf32>
    %25 = vector.extract_strided_slice %21 {offsets = [0, 32], sizes = [2, 32], strides = [1, 1]} : vector<2x96xf32> to vector<2x32xf32>
    %26 = vector.extract_strided_slice %21 {offsets = [0, 64], sizes = [2, 32], strides = [1, 1]} : vector<2x96xf32> to vector<2x32xf32>
    %27 = arith.mulf %25, %13 : vector<2x32xf32>
    %28 = arith.mulf %24, %23 : vector<2x32xf32>
    %29 = arith.addf %27, %28 : vector<2x32xf32>
    %30 = math.tanh %29 : vector<2x32xf32>
    %31 = arith.mulf %26, %30 : vector<2x32xf32>
    %32 = vector.extract_strided_slice %12 {offsets = [2, 0], sizes = [2, 128], strides = [1, 1]} : vector<16x128xf32> to vector<2x128xf32>
    %33 = arith.truncf %31 : vector<2x32xf32> to vector<2x32xbf16>
    %cst_16 = arith.constant dense<0.000000e+00> : vector<2x128xf32>
    %34 = tpu.matmul %33, %2, %cst_16 {dimension_numbers = #tpu.dot_dimension_numbers<[1], [0], [0], [1], [0, 0, 1, 1], [], []>} : vector<2x32xbf16>, vector<32x128xbf16>, vector<2x128xf32> -> vector<2x128xf32>
    %35 = arith.addf %32, %34 : vector<2x128xf32>
    %36 = vector.extract_strided_slice %35 {offsets = [0, 0], sizes = [2, 96], strides = [1, 1]} : vector<2x128xf32> to vector<2x96xf32>
    %37 = arith.negf %36 : vector<2x96xf32>
    %38 = math.exp %37 : vector<2x96xf32>
    %cst_17 = arith.constant 1.000000e+00 : f32
    %39 = vector.broadcast %cst_17 : f32 to vector<2x96xf32>
    %40 = arith.addf %39, %38 : vector<2x96xf32>
    %41 = arith.divf %39, %40 : vector<2x96xf32>
    %42 = vector.extract_strided_slice %35 {offsets = [0, 96], sizes = [2, 32], strides = [1, 1]} : vector<2x128xf32> to vector<2x32xf32>
    %43 = math.tanh %42 : vector<2x32xf32>
    %44 = vector.extract_strided_slice %41 {offsets = [0, 0], sizes = [2, 32], strides = [1, 1]} : vector<2x96xf32> to vector<2x32xf32>
    %45 = vector.extract_strided_slice %41 {offsets = [0, 32], sizes = [2, 32], strides = [1, 1]} : vector<2x96xf32> to vector<2x32xf32>
    %46 = vector.extract_strided_slice %41 {offsets = [0, 64], sizes = [2, 32], strides = [1, 1]} : vector<2x96xf32> to vector<2x32xf32>
    %47 = arith.mulf %45, %29 : vector<2x32xf32>
    %48 = arith.mulf %44, %43 : vector<2x32xf32>
    %49 = arith.addf %47, %48 : vector<2x32xf32>
    %50 = math.tanh %49 : vector<2x32xf32>
    %51 = arith.mulf %46, %50 : vector<2x32xf32>
    %52 = arith.truncf %31 : vector<2x32xf32> to vector<2x32xbf16>
    %cst_18 = arith.constant dense<0.000000e+00> : vector<2x128xf32>
    %53 = tpu.matmul %52, %1, %cst_18 {dimension_numbers = #tpu.dot_dimension_numbers<[1], [0], [0], [1], [0, 0, 1, 1], [], []>} : vector<2x32xbf16>, vector<32x128xbf16>, vector<2x128xf32> -> vector<2x128xf32>
    %54 = arith.addf %53, %7 : vector<2x128xf32>
    %55 = vector.extract_strided_slice %54 {offsets = [0, 0], sizes = [2, 96], strides = [1, 1]} : vector<2x128xf32> to vector<2x96xf32>
    %56 = arith.negf %55 : vector<2x96xf32>
    %57 = math.exp %56 : vector<2x96xf32>
    %cst_19 = arith.constant 1.000000e+00 : f32
    %58 = vector.broadcast %cst_19 : f32 to vector<2x96xf32>
    %59 = arith.addf %58, %57 : vector<2x96xf32>
    %60 = arith.divf %58, %59 : vector<2x96xf32>
    %61 = vector.extract_strided_slice %54 {offsets = [0, 96], sizes = [2, 32], strides = [1, 1]} : vector<2x128xf32> to vector<2x32xf32>
    %62 = math.tanh %61 : vector<2x32xf32>
    %63 = vector.extract_strided_slice %60 {offsets = [0, 0], sizes = [2, 32], strides = [1, 1]} : vector<2x96xf32> to vector<2x32xf32>
    %64 = vector.extract_strided_slice %60 {offsets = [0, 32], sizes = [2, 32], strides = [1, 1]} : vector<2x96xf32> to vector<2x32xf32>
    %65 = vector.extract_strided_slice %60 {offsets = [0, 64], sizes = [2, 32], strides = [1, 1]} : vector<2x96xf32> to vector<2x32xf32>
    %66 = arith.mulf %64, %14 : vector<2x32xf32>
    %67 = arith.mulf %63, %62 : vector<2x32xf32>
    %68 = arith.addf %66, %67 : vector<2x32xf32>
    %69 = math.tanh %68 : vector<2x32xf32>
    %70 = arith.mulf %65, %69 : vector<2x32xf32>
    %71 = vector.extract_strided_slice %12 {offsets = [4, 0], sizes = [2, 128], strides = [1, 1]} : vector<16x128xf32> to vector<2x128xf32>
    %72 = arith.truncf %51 : vector<2x32xf32> to vector<2x32xbf16>
    %cst_20 = arith.constant dense<0.000000e+00> : vector<2x128xf32>
    %73 = tpu.matmul %72, %2, %cst_20 {dimension_numbers = #tpu.dot_dimension_numbers<[1], [0], [0], [1], [0, 0, 1, 1], [], []>} : vector<2x32xbf16>, vector<32x128xbf16>, vector<2x128xf32> -> vector<2x128xf32>
    %74 = arith.addf %71, %73 : vector<2x128xf32>
    %75 = vector.extract_strided_slice %74 {offsets = [0, 0], sizes = [2, 96], strides = [1, 1]} : vector<2x128xf32> to vector<2x96xf32>
    %76 = arith.negf %75 : vector<2x96xf32>
    %77 = math.exp %76 : vector<2x96xf32>
    %cst_21 = arith.constant 1.000000e+00 : f32
    %78 = vector.broadcast %cst_21 : f32 to vector<2x96xf32>
    %79 = arith.addf %78, %77 : vector<2x96xf32>
    %80 = arith.divf %78, %79 : vector<2x96xf32>
    %81 = vector.extract_strided_slice %74 {offsets = [0, 96], sizes = [2, 32], strides = [1, 1]} : vector<2x128xf32> to vector<2x32xf32>
    %82 = math.tanh %81 : vector<2x32xf32>
    %83 = vector.extract_strided_slice %80 {offsets = [0, 0], sizes = [2, 32], strides = [1, 1]} : vector<2x96xf32> to vector<2x32xf32>
    %84 = vector.extract_strided_slice %80 {offsets = [0, 32], sizes = [2, 32], strides = [1, 1]} : vector<2x96xf32> to vector<2x32xf32>
    %85 = vector.extract_strided_slice %80 {offsets = [0, 64], sizes = [2, 32], strides = [1, 1]} : vector<2x96xf32> to vector<2x32xf32>
    %86 = arith.mulf %84, %49 : vector<2x32xf32>
    %87 = arith.mulf %83, %82 : vector<2x32xf32>
    %88 = arith.addf %86, %87 : vector<2x32xf32>
    %89 = math.tanh %88 : vector<2x32xf32>
    %90 = arith.mulf %85, %89 : vector<2x32xf32>
    %91 = arith.truncf %51 : vector<2x32xf32> to vector<2x32xbf16>
    %cst_22 = arith.constant dense<0.000000e+00> : vector<2x128xf32>
    %92 = tpu.matmul %91, %1, %cst_22 {dimension_numbers = #tpu.dot_dimension_numbers<[1], [0], [0], [1], [0, 0, 1, 1], [], []>} : vector<2x32xbf16>, vector<32x128xbf16>, vector<2x128xf32> -> vector<2x128xf32>
    %93 = arith.addf %92, %7 : vector<2x128xf32>
    %94 = arith.truncf %70 : vector<2x32xf32> to vector<2x32xbf16>
    %cst_23 = arith.constant dense<0.000000e+00> : vector<2x128xf32>
    %95 = tpu.matmul %94, %3, %cst_23 {dimension_numbers = #tpu.dot_dimension_numbers<[1], [0], [0], [1], [0, 0, 1, 1], [], []>} : vector<2x32xbf16>, vector<32x128xbf16>, vector<2x128xf32> -> vector<2x128xf32>
    %96 = arith.addf %93, %95 : vector<2x128xf32>
    %97 = vector.extract_strided_slice %96 {offsets = [0, 0], sizes = [2, 96], strides = [1, 1]} : vector<2x128xf32> to vector<2x96xf32>
    %98 = arith.negf %97 : vector<2x96xf32>
    %99 = math.exp %98 : vector<2x96xf32>
    %cst_24 = arith.constant 1.000000e+00 : f32
    %100 = vector.broadcast %cst_24 : f32 to vector<2x96xf32>
    %101 = arith.addf %100, %99 : vector<2x96xf32>
    %102 = arith.divf %100, %101 : vector<2x96xf32>
    %103 = vector.extract_strided_slice %96 {offsets = [0, 96], sizes = [2, 32], strides = [1, 1]} : vector<2x128xf32> to vector<2x32xf32>
    %104 = math.tanh %103 : vector<2x32xf32>
    %105 = vector.extract_strided_slice %102 {offsets = [0, 0], sizes = [2, 32], strides = [1, 1]} : vector<2x96xf32> to vector<2x32xf32>
    %106 = vector.extract_strided_slice %102 {offsets = [0, 32], sizes = [2, 32], strides = [1, 1]} : vector<2x96xf32> to vector<2x32xf32>
    %107 = vector.extract_strided_slice %102 {offsets = [0, 64], sizes = [2, 32], strides = [1, 1]} : vector<2x96xf32> to vector<2x32xf32>
    %108 = arith.mulf %106, %68 : vector<2x32xf32>
    %109 = arith.mulf %105, %104 : vector<2x32xf32>
    %110 = arith.addf %108, %109 : vector<2x32xf32>
    %111 = math.tanh %110 : vector<2x32xf32>
    %112 = arith.mulf %107, %111 : vector<2x32xf32>
    %113 = vector.extract_strided_slice %12 {offsets = [6, 0], sizes = [2, 128], strides = [1, 1]} : vector<16x128xf32> to vector<2x128xf32>
    %114 = arith.truncf %90 : vector<2x32xf32> to vector<2x32xbf16>
    %cst_25 = arith.constant dense<0.000000e+00> : vector<2x128xf32>
    %115 = tpu.matmul %114, %2, %cst_25 {dimension_numbers = #tpu.dot_dimension_numbers<[1], [0], [0], [1], [0, 0, 1, 1], [], []>} : vector<2x32xbf16>, vector<32x128xbf16>, vector<2x128xf32> -> vector<2x128xf32>
    %116 = arith.addf %113, %115 : vector<2x128xf32>
    %117 = vector.extract_strided_slice %116 {offsets = [0, 0], sizes = [2, 96], strides = [1, 1]} : vector<2x128xf32> to vector<2x96xf32>
    %118 = arith.negf %117 : vector<2x96xf32>
    %119 = math.exp %118 : vector<2x96xf32>
    %cst_26 = arith.constant 1.000000e+00 : f32
    %120 = vector.broadcast %cst_26 : f32 to vector<2x96xf32>
    %121 = arith.addf %120, %119 : vector<2x96xf32>
    %122 = arith.divf %120, %121 : vector<2x96xf32>
    %123 = vector.extract_strided_slice %116 {offsets = [0, 96], sizes = [2, 32], strides = [1, 1]} : vector<2x128xf32> to vector<2x32xf32>
    %124 = math.tanh %123 : vector<2x32xf32>
    %125 = vector.extract_strided_slice %122 {offsets = [0, 0], sizes = [2, 32], strides = [1, 1]} : vector<2x96xf32> to vector<2x32xf32>
    %126 = vector.extract_strided_slice %122 {offsets = [0, 32], sizes = [2, 32], strides = [1, 1]} : vector<2x96xf32> to vector<2x32xf32>
    %127 = vector.extract_strided_slice %122 {offsets = [0, 64], sizes = [2, 32], strides = [1, 1]} : vector<2x96xf32> to vector<2x32xf32>
    %128 = arith.mulf %126, %88 : vector<2x32xf32>
    %129 = arith.mulf %125, %124 : vector<2x32xf32>
    %130 = arith.addf %128, %129 : vector<2x32xf32>
    %131 = math.tanh %130 : vector<2x32xf32>
    %132 = arith.mulf %127, %131 : vector<2x32xf32>
    %133 = arith.truncf %90 : vector<2x32xf32> to vector<2x32xbf16>
    %cst_27 = arith.constant dense<0.000000e+00> : vector<2x128xf32>
    %134 = tpu.matmul %133, %1, %cst_27 {dimension_numbers = #tpu.dot_dimension_numbers<[1], [0], [0], [1], [0, 0, 1, 1], [], []>} : vector<2x32xbf16>, vector<32x128xbf16>, vector<2x128xf32> -> vector<2x128xf32>
    %135 = arith.addf %134, %7 : vector<2x128xf32>
    %136 = arith.truncf %112 : vector<2x32xf32> to vector<2x32xbf16>
    %cst_28 = arith.constant dense<0.000000e+00> : vector<2x128xf32>
    %137 = tpu.matmul %136, %3, %cst_28 {dimension_numbers = #tpu.dot_dimension_numbers<[1], [0], [0], [1], [0, 0, 1, 1], [], []>} : vector<2x32xbf16>, vector<32x128xbf16>, vector<2x128xf32> -> vector<2x128xf32>
    %138 = arith.addf %135, %137 : vector<2x128xf32>
    %139 = vector.extract_strided_slice %138 {offsets = [0, 0], sizes = [2, 96], strides = [1, 1]} : vector<2x128xf32> to vector<2x96xf32>
    %140 = arith.negf %139 : vector<2x96xf32>
    %141 = math.exp %140 : vector<2x96xf32>
    %cst_29 = arith.constant 1.000000e+00 : f32
    %142 = vector.broadcast %cst_29 : f32 to vector<2x96xf32>
    %143 = arith.addf %142, %141 : vector<2x96xf32>
    %144 = arith.divf %142, %143 : vector<2x96xf32>
    %145 = vector.extract_strided_slice %138 {offsets = [0, 96], sizes = [2, 32], strides = [1, 1]} : vector<2x128xf32> to vector<2x32xf32>
    %146 = math.tanh %145 : vector<2x32xf32>
    %147 = vector.extract_strided_slice %144 {offsets = [0, 0], sizes = [2, 32], strides = [1, 1]} : vector<2x96xf32> to vector<2x32xf32>
    %148 = vector.extract_strided_slice %144 {offsets = [0, 32], sizes = [2, 32], strides = [1, 1]} : vector<2x96xf32> to vector<2x32xf32>
    %149 = vector.extract_strided_slice %144 {offsets = [0, 64], sizes = [2, 32], strides = [1, 1]} : vector<2x96xf32> to vector<2x32xf32>
    %150 = arith.mulf %148, %110 : vector<2x32xf32>
    %151 = arith.mulf %147, %146 : vector<2x32xf32>
    %152 = arith.addf %150, %151 : vector<2x32xf32>
    %153 = math.tanh %152 : vector<2x32xf32>
    %154 = arith.mulf %149, %153 : vector<2x32xf32>
    %155 = vector.extract_strided_slice %12 {offsets = [8, 0], sizes = [2, 128], strides = [1, 1]} : vector<16x128xf32> to vector<2x128xf32>
    %156 = arith.truncf %132 : vector<2x32xf32> to vector<2x32xbf16>
    %cst_30 = arith.constant dense<0.000000e+00> : vector<2x128xf32>
    %157 = tpu.matmul %156, %2, %cst_30 {dimension_numbers = #tpu.dot_dimension_numbers<[1], [0], [0], [1], [0, 0, 1, 1], [], []>} : vector<2x32xbf16>, vector<32x128xbf16>, vector<2x128xf32> -> vector<2x128xf32>
    %158 = arith.addf %155, %157 : vector<2x128xf32>
    %159 = vector.extract_strided_slice %158 {offsets = [0, 0], sizes = [2, 96], strides = [1, 1]} : vector<2x128xf32> to vector<2x96xf32>
    %160 = arith.negf %159 : vector<2x96xf32>
    %161 = math.exp %160 : vector<2x96xf32>
    %cst_31 = arith.constant 1.000000e+00 : f32
    %162 = vector.broadcast %cst_31 : f32 to vector<2x96xf32>
    %163 = arith.addf %162, %161 : vector<2x96xf32>
    %164 = arith.divf %162, %163 : vector<2x96xf32>
    %165 = vector.extract_strided_slice %158 {offsets = [0, 96], sizes = [2, 32], strides = [1, 1]} : vector<2x128xf32> to vector<2x32xf32>
    %166 = math.tanh %165 : vector<2x32xf32>
    %167 = vector.extract_strided_slice %164 {offsets = [0, 0], sizes = [2, 32], strides = [1, 1]} : vector<2x96xf32> to vector<2x32xf32>
    %168 = vector.extract_strided_slice %164 {offsets = [0, 32], sizes = [2, 32], strides = [1, 1]} : vector<2x96xf32> to vector<2x32xf32>
    %169 = vector.extract_strided_slice %164 {offsets = [0, 64], sizes = [2, 32], strides = [1, 1]} : vector<2x96xf32> to vector<2x32xf32>
    %170 = arith.mulf %168, %130 : vector<2x32xf32>
    %171 = arith.mulf %167, %166 : vector<2x32xf32>
    %172 = arith.addf %170, %171 : vector<2x32xf32>
    %173 = math.tanh %172 : vector<2x32xf32>
    %174 = arith.mulf %169, %173 : vector<2x32xf32>
    %175 = arith.truncf %132 : vector<2x32xf32> to vector<2x32xbf16>
    %cst_32 = arith.constant dense<0.000000e+00> : vector<2x128xf32>
    %176 = tpu.matmul %175, %1, %cst_32 {dimension_numbers = #tpu.dot_dimension_numbers<[1], [0], [0], [1], [0, 0, 1, 1], [], []>} : vector<2x32xbf16>, vector<32x128xbf16>, vector<2x128xf32> -> vector<2x128xf32>
    %177 = arith.addf %176, %7 : vector<2x128xf32>
    %178 = arith.truncf %154 : vector<2x32xf32> to vector<2x32xbf16>
    %cst_33 = arith.constant dense<0.000000e+00> : vector<2x128xf32>
    %179 = tpu.matmul %178, %3, %cst_33 {dimension_numbers = #tpu.dot_dimension_numbers<[1], [0], [0], [1], [0, 0, 1, 1], [], []>} : vector<2x32xbf16>, vector<32x128xbf16>, vector<2x128xf32> -> vector<2x128xf32>
    %180 = arith.addf %177, %179 : vector<2x128xf32>
    %181 = vector.extract_strided_slice %180 {offsets = [0, 0], sizes = [2, 96], strides = [1, 1]} : vector<2x128xf32> to vector<2x96xf32>
    %182 = arith.negf %181 : vector<2x96xf32>
    %183 = math.exp %182 : vector<2x96xf32>
    %cst_34 = arith.constant 1.000000e+00 : f32
    %184 = vector.broadcast %cst_34 : f32 to vector<2x96xf32>
    %185 = arith.addf %184, %183 : vector<2x96xf32>
    %186 = arith.divf %184, %185 : vector<2x96xf32>
    %187 = vector.extract_strided_slice %180 {offsets = [0, 96], sizes = [2, 32], strides = [1, 1]} : vector<2x128xf32> to vector<2x32xf32>
    %188 = math.tanh %187 : vector<2x32xf32>
    %189 = vector.extract_strided_slice %186 {offsets = [0, 0], sizes = [2, 32], strides = [1, 1]} : vector<2x96xf32> to vector<2x32xf32>
    %190 = vector.extract_strided_slice %186 {offsets = [0, 32], sizes = [2, 32], strides = [1, 1]} : vector<2x96xf32> to vector<2x32xf32>
    %191 = vector.extract_strided_slice %186 {offsets = [0, 64], sizes = [2, 32], strides = [1, 1]} : vector<2x96xf32> to vector<2x32xf32>
    %192 = arith.mulf %190, %152 : vector<2x32xf32>
    %193 = arith.mulf %189, %188 : vector<2x32xf32>
    %194 = arith.addf %192, %193 : vector<2x32xf32>
    %195 = math.tanh %194 : vector<2x32xf32>
    %196 = arith.mulf %191, %195 : vector<2x32xf32>
    %197 = vector.extract_strided_slice %12 {offsets = [10, 0], sizes = [2, 128], strides = [1, 1]} : vector<16x128xf32> to vector<2x128xf32>
    %198 = arith.truncf %174 : vector<2x32xf32> to vector<2x32xbf16>
    %cst_35 = arith.constant dense<0.000000e+00> : vector<2x128xf32>
    %199 = tpu.matmul %198, %2, %cst_35 {dimension_numbers = #tpu.dot_dimension_numbers<[1], [0], [0], [1], [0, 0, 1, 1], [], []>} : vector<2x32xbf16>, vector<32x128xbf16>, vector<2x128xf32> -> vector<2x128xf32>
    %200 = arith.addf %197, %199 : vector<2x128xf32>
    %201 = vector.extract_strided_slice %200 {offsets = [0, 0], sizes = [2, 96], strides = [1, 1]} : vector<2x128xf32> to vector<2x96xf32>
    %202 = arith.negf %201 : vector<2x96xf32>
    %203 = math.exp %202 : vector<2x96xf32>
    %cst_36 = arith.constant 1.000000e+00 : f32
    %204 = vector.broadcast %cst_36 : f32 to vector<2x96xf32>
    %205 = arith.addf %204, %203 : vector<2x96xf32>
    %206 = arith.divf %204, %205 : vector<2x96xf32>
    %207 = vector.extract_strided_slice %200 {offsets = [0, 96], sizes = [2, 32], strides = [1, 1]} : vector<2x128xf32> to vector<2x32xf32>
    %208 = math.tanh %207 : vector<2x32xf32>
    %209 = vector.extract_strided_slice %206 {offsets = [0, 0], sizes = [2, 32], strides = [1, 1]} : vector<2x96xf32> to vector<2x32xf32>
    %210 = vector.extract_strided_slice %206 {offsets = [0, 32], sizes = [2, 32], strides = [1, 1]} : vector<2x96xf32> to vector<2x32xf32>
    %211 = vector.extract_strided_slice %206 {offsets = [0, 64], sizes = [2, 32], strides = [1, 1]} : vector<2x96xf32> to vector<2x32xf32>
    %212 = arith.mulf %210, %172 : vector<2x32xf32>
    %213 = arith.mulf %209, %208 : vector<2x32xf32>
    %214 = arith.addf %212, %213 : vector<2x32xf32>
    %215 = math.tanh %214 : vector<2x32xf32>
    %216 = arith.mulf %211, %215 : vector<2x32xf32>
    %217 = arith.truncf %174 : vector<2x32xf32> to vector<2x32xbf16>
    %cst_37 = arith.constant dense<0.000000e+00> : vector<2x128xf32>
    %218 = tpu.matmul %217, %1, %cst_37 {dimension_numbers = #tpu.dot_dimension_numbers<[1], [0], [0], [1], [0, 0, 1, 1], [], []>} : vector<2x32xbf16>, vector<32x128xbf16>, vector<2x128xf32> -> vector<2x128xf32>
    %219 = arith.addf %218, %7 : vector<2x128xf32>
    %220 = arith.truncf %196 : vector<2x32xf32> to vector<2x32xbf16>
    %cst_38 = arith.constant dense<0.000000e+00> : vector<2x128xf32>
    %221 = tpu.matmul %220, %3, %cst_38 {dimension_numbers = #tpu.dot_dimension_numbers<[1], [0], [0], [1], [0, 0, 1, 1], [], []>} : vector<2x32xbf16>, vector<32x128xbf16>, vector<2x128xf32> -> vector<2x128xf32>
    %222 = arith.addf %219, %221 : vector<2x128xf32>
    %223 = vector.extract_strided_slice %222 {offsets = [0, 0], sizes = [2, 96], strides = [1, 1]} : vector<2x128xf32> to vector<2x96xf32>
    %224 = arith.negf %223 : vector<2x96xf32>
    %225 = math.exp %224 : vector<2x96xf32>
    %cst_39 = arith.constant 1.000000e+00 : f32
    %226 = vector.broadcast %cst_39 : f32 to vector<2x96xf32>
    %227 = arith.addf %226, %225 : vector<2x96xf32>
    %228 = arith.divf %226, %227 : vector<2x96xf32>
    %229 = vector.extract_strided_slice %222 {offsets = [0, 96], sizes = [2, 32], strides = [1, 1]} : vector<2x128xf32> to vector<2x32xf32>
    %230 = math.tanh %229 : vector<2x32xf32>
    %231 = vector.extract_strided_slice %228 {offsets = [0, 0], sizes = [2, 32], strides = [1, 1]} : vector<2x96xf32> to vector<2x32xf32>
    %232 = vector.extract_strided_slice %228 {offsets = [0, 32], sizes = [2, 32], strides = [1, 1]} : vector<2x96xf32> to vector<2x32xf32>
    %233 = vector.extract_strided_slice %228 {offsets = [0, 64], sizes = [2, 32], strides = [1, 1]} : vector<2x96xf32> to vector<2x32xf32>
    %234 = arith.mulf %232, %194 : vector<2x32xf32>
    %235 = arith.mulf %231, %230 : vector<2x32xf32>
    %236 = arith.addf %234, %235 : vector<2x32xf32>
    %237 = math.tanh %236 : vector<2x32xf32>
    %238 = arith.mulf %233, %237 : vector<2x32xf32>
    %239 = vector.extract_strided_slice %12 {offsets = [12, 0], sizes = [2, 128], strides = [1, 1]} : vector<16x128xf32> to vector<2x128xf32>
    %240 = arith.truncf %216 : vector<2x32xf32> to vector<2x32xbf16>
    %cst_40 = arith.constant dense<0.000000e+00> : vector<2x128xf32>
    %241 = tpu.matmul %240, %2, %cst_40 {dimension_numbers = #tpu.dot_dimension_numbers<[1], [0], [0], [1], [0, 0, 1, 1], [], []>} : vector<2x32xbf16>, vector<32x128xbf16>, vector<2x128xf32> -> vector<2x128xf32>
    %242 = arith.addf %239, %241 : vector<2x128xf32>
    %243 = vector.extract_strided_slice %242 {offsets = [0, 0], sizes = [2, 96], strides = [1, 1]} : vector<2x128xf32> to vector<2x96xf32>
    %244 = arith.negf %243 : vector<2x96xf32>
    %245 = math.exp %244 : vector<2x96xf32>
    %cst_41 = arith.constant 1.000000e+00 : f32
    %246 = vector.broadcast %cst_41 : f32 to vector<2x96xf32>
    %247 = arith.addf %246, %245 : vector<2x96xf32>
    %248 = arith.divf %246, %247 : vector<2x96xf32>
    %249 = vector.extract_strided_slice %242 {offsets = [0, 96], sizes = [2, 32], strides = [1, 1]} : vector<2x128xf32> to vector<2x32xf32>
    %250 = math.tanh %249 : vector<2x32xf32>
    %251 = vector.extract_strided_slice %248 {offsets = [0, 0], sizes = [2, 32], strides = [1, 1]} : vector<2x96xf32> to vector<2x32xf32>
    %252 = vector.extract_strided_slice %248 {offsets = [0, 32], sizes = [2, 32], strides = [1, 1]} : vector<2x96xf32> to vector<2x32xf32>
    %253 = vector.extract_strided_slice %248 {offsets = [0, 64], sizes = [2, 32], strides = [1, 1]} : vector<2x96xf32> to vector<2x32xf32>
    %254 = arith.mulf %252, %214 : vector<2x32xf32>
    %255 = arith.mulf %251, %250 : vector<2x32xf32>
    %256 = arith.addf %254, %255 : vector<2x32xf32>
    %257 = math.tanh %256 : vector<2x32xf32>
    %258 = arith.mulf %253, %257 : vector<2x32xf32>
    %259 = arith.truncf %216 : vector<2x32xf32> to vector<2x32xbf16>
    %cst_42 = arith.constant dense<0.000000e+00> : vector<2x128xf32>
    %260 = tpu.matmul %259, %1, %cst_42 {dimension_numbers = #tpu.dot_dimension_numbers<[1], [0], [0], [1], [0, 0, 1, 1], [], []>} : vector<2x32xbf16>, vector<32x128xbf16>, vector<2x128xf32> -> vector<2x128xf32>
    %261 = arith.addf %260, %7 : vector<2x128xf32>
    %262 = arith.truncf %238 : vector<2x32xf32> to vector<2x32xbf16>
    %cst_43 = arith.constant dense<0.000000e+00> : vector<2x128xf32>
    %263 = tpu.matmul %262, %3, %cst_43 {dimension_numbers = #tpu.dot_dimension_numbers<[1], [0], [0], [1], [0, 0, 1, 1], [], []>} : vector<2x32xbf16>, vector<32x128xbf16>, vector<2x128xf32> -> vector<2x128xf32>
    %264 = arith.addf %261, %263 : vector<2x128xf32>
    %265 = vector.extract_strided_slice %264 {offsets = [0, 0], sizes = [2, 96], strides = [1, 1]} : vector<2x128xf32> to vector<2x96xf32>
    %266 = arith.negf %265 : vector<2x96xf32>
    %267 = math.exp %266 : vector<2x96xf32>
    %cst_44 = arith.constant 1.000000e+00 : f32
    %268 = vector.broadcast %cst_44 : f32 to vector<2x96xf32>
    %269 = arith.addf %268, %267 : vector<2x96xf32>
    %270 = arith.divf %268, %269 : vector<2x96xf32>
    %271 = vector.extract_strided_slice %264 {offsets = [0, 96], sizes = [2, 32], strides = [1, 1]} : vector<2x128xf32> to vector<2x32xf32>
    %272 = math.tanh %271 : vector<2x32xf32>
    %273 = vector.extract_strided_slice %270 {offsets = [0, 0], sizes = [2, 32], strides = [1, 1]} : vector<2x96xf32> to vector<2x32xf32>
    %274 = vector.extract_strided_slice %270 {offsets = [0, 32], sizes = [2, 32], strides = [1, 1]} : vector<2x96xf32> to vector<2x32xf32>
    %275 = vector.extract_strided_slice %270 {offsets = [0, 64], sizes = [2, 32], strides = [1, 1]} : vector<2x96xf32> to vector<2x32xf32>
    %276 = arith.mulf %274, %236 : vector<2x32xf32>
    %277 = arith.mulf %273, %272 : vector<2x32xf32>
    %278 = arith.addf %276, %277 : vector<2x32xf32>
    %279 = math.tanh %278 : vector<2x32xf32>
    %280 = arith.mulf %275, %279 : vector<2x32xf32>
    %281 = vector.extract_strided_slice %12 {offsets = [14, 0], sizes = [2, 128], strides = [1, 1]} : vector<16x128xf32> to vector<2x128xf32>
    %282 = arith.truncf %258 : vector<2x32xf32> to vector<2x32xbf16>
    %cst_45 = arith.constant dense<0.000000e+00> : vector<2x128xf32>
    %283 = tpu.matmul %282, %2, %cst_45 {dimension_numbers = #tpu.dot_dimension_numbers<[1], [0], [0], [1], [0, 0, 1, 1], [], []>} : vector<2x32xbf16>, vector<32x128xbf16>, vector<2x128xf32> -> vector<2x128xf32>
    %284 = arith.addf %281, %283 : vector<2x128xf32>
    %285 = vector.extract_strided_slice %284 {offsets = [0, 0], sizes = [2, 96], strides = [1, 1]} : vector<2x128xf32> to vector<2x96xf32>
    %286 = arith.negf %285 : vector<2x96xf32>
    %287 = math.exp %286 : vector<2x96xf32>
    %cst_46 = arith.constant 1.000000e+00 : f32
    %288 = vector.broadcast %cst_46 : f32 to vector<2x96xf32>
    %289 = arith.addf %288, %287 : vector<2x96xf32>
    %290 = arith.divf %288, %289 : vector<2x96xf32>
    %291 = vector.extract_strided_slice %284 {offsets = [0, 96], sizes = [2, 32], strides = [1, 1]} : vector<2x128xf32> to vector<2x32xf32>
    %292 = math.tanh %291 : vector<2x32xf32>
    %293 = vector.extract_strided_slice %290 {offsets = [0, 0], sizes = [2, 32], strides = [1, 1]} : vector<2x96xf32> to vector<2x32xf32>
    %294 = vector.extract_strided_slice %290 {offsets = [0, 32], sizes = [2, 32], strides = [1, 1]} : vector<2x96xf32> to vector<2x32xf32>
    %295 = vector.extract_strided_slice %290 {offsets = [0, 64], sizes = [2, 32], strides = [1, 1]} : vector<2x96xf32> to vector<2x32xf32>
    %296 = arith.mulf %294, %256 : vector<2x32xf32>
    %297 = arith.mulf %293, %292 : vector<2x32xf32>
    %298 = arith.addf %296, %297 : vector<2x32xf32>
    %299 = math.tanh %298 : vector<2x32xf32>
    %300 = arith.mulf %295, %299 : vector<2x32xf32>
    %301 = arith.truncf %258 : vector<2x32xf32> to vector<2x32xbf16>
    %cst_47 = arith.constant dense<0.000000e+00> : vector<2x128xf32>
    %302 = tpu.matmul %301, %1, %cst_47 {dimension_numbers = #tpu.dot_dimension_numbers<[1], [0], [0], [1], [0, 0, 1, 1], [], []>} : vector<2x32xbf16>, vector<32x128xbf16>, vector<2x128xf32> -> vector<2x128xf32>
    %303 = arith.addf %302, %7 : vector<2x128xf32>
    %304 = arith.truncf %280 : vector<2x32xf32> to vector<2x32xbf16>
    %cst_48 = arith.constant dense<0.000000e+00> : vector<2x128xf32>
    %305 = tpu.matmul %304, %3, %cst_48 {dimension_numbers = #tpu.dot_dimension_numbers<[1], [0], [0], [1], [0, 0, 1, 1], [], []>} : vector<2x32xbf16>, vector<32x128xbf16>, vector<2x128xf32> -> vector<2x128xf32>
    %306 = arith.addf %303, %305 : vector<2x128xf32>
    %307 = vector.extract_strided_slice %306 {offsets = [0, 0], sizes = [2, 96], strides = [1, 1]} : vector<2x128xf32> to vector<2x96xf32>
    %308 = arith.negf %307 : vector<2x96xf32>
    %309 = math.exp %308 : vector<2x96xf32>
    %cst_49 = arith.constant 1.000000e+00 : f32
    %310 = vector.broadcast %cst_49 : f32 to vector<2x96xf32>
    %311 = arith.addf %310, %309 : vector<2x96xf32>
    %312 = arith.divf %310, %311 : vector<2x96xf32>
    %313 = vector.extract_strided_slice %306 {offsets = [0, 96], sizes = [2, 32], strides = [1, 1]} : vector<2x128xf32> to vector<2x32xf32>
    %314 = math.tanh %313 : vector<2x32xf32>
    %315 = vector.extract_strided_slice %312 {offsets = [0, 0], sizes = [2, 32], strides = [1, 1]} : vector<2x96xf32> to vector<2x32xf32>
    %316 = vector.extract_strided_slice %312 {offsets = [0, 32], sizes = [2, 32], strides = [1, 1]} : vector<2x96xf32> to vector<2x32xf32>
    %317 = vector.extract_strided_slice %312 {offsets = [0, 64], sizes = [2, 32], strides = [1, 1]} : vector<2x96xf32> to vector<2x32xf32>
    %318 = arith.mulf %316, %278 : vector<2x32xf32>
    %319 = arith.mulf %315, %314 : vector<2x32xf32>
    %320 = arith.addf %318, %319 : vector<2x32xf32>
    %321 = math.tanh %320 : vector<2x32xf32>
    %322 = arith.mulf %317, %321 : vector<2x32xf32>
    %323 = arith.truncf %300 : vector<2x32xf32> to vector<2x32xbf16>
    %cst_50 = arith.constant dense<0.000000e+00> : vector<2x128xf32>
    %324 = tpu.matmul %323, %1, %cst_50 {dimension_numbers = #tpu.dot_dimension_numbers<[1], [0], [0], [1], [0, 0, 1, 1], [], []>} : vector<2x32xbf16>, vector<32x128xbf16>, vector<2x128xf32> -> vector<2x128xf32>
    %325 = arith.addf %324, %7 : vector<2x128xf32>
    %326 = arith.truncf %322 : vector<2x32xf32> to vector<2x32xbf16>
    %cst_51 = arith.constant dense<0.000000e+00> : vector<2x128xf32>
    %327 = tpu.matmul %326, %3, %cst_51 {dimension_numbers = #tpu.dot_dimension_numbers<[1], [0], [0], [1], [0, 0, 1, 1], [], []>} : vector<2x32xbf16>, vector<32x128xbf16>, vector<2x128xf32> -> vector<2x128xf32>
    %328 = arith.addf %325, %327 : vector<2x128xf32>
    %329 = vector.extract_strided_slice %328 {offsets = [0, 0], sizes = [2, 96], strides = [1, 1]} : vector<2x128xf32> to vector<2x96xf32>
    %330 = arith.negf %329 : vector<2x96xf32>
    %331 = math.exp %330 : vector<2x96xf32>
    %cst_52 = arith.constant 1.000000e+00 : f32
    %332 = vector.broadcast %cst_52 : f32 to vector<2x96xf32>
    %333 = arith.addf %332, %331 : vector<2x96xf32>
    %334 = arith.divf %332, %333 : vector<2x96xf32>
    %335 = vector.extract_strided_slice %328 {offsets = [0, 96], sizes = [2, 32], strides = [1, 1]} : vector<2x128xf32> to vector<2x32xf32>
    %336 = math.tanh %335 : vector<2x32xf32>
    %337 = vector.extract_strided_slice %334 {offsets = [0, 0], sizes = [2, 32], strides = [1, 1]} : vector<2x96xf32> to vector<2x32xf32>
    %338 = vector.extract_strided_slice %334 {offsets = [0, 32], sizes = [2, 32], strides = [1, 1]} : vector<2x96xf32> to vector<2x32xf32>
    %339 = vector.extract_strided_slice %334 {offsets = [0, 64], sizes = [2, 32], strides = [1, 1]} : vector<2x96xf32> to vector<2x32xf32>
    %340 = arith.mulf %338, %320 : vector<2x32xf32>
    %341 = arith.mulf %337, %336 : vector<2x32xf32>
    %342 = arith.addf %340, %341 : vector<2x32xf32>
    %343 = math.tanh %342 : vector<2x32xf32>
    %344 = arith.mulf %339, %343 : vector<2x32xf32>
    %c0_53 = arith.constant 0 : index
    %c0_54 = arith.constant 0 : index
    %345 = vector.load %arg8[%c0_53, %c0_54] : memref<32x4xf32, #tpu.memory_space<vmem>>, vector<32x4xf32>
    %cst_55 = arith.constant dense<0.000000e+00> : vector<2x4xf32>
    %346 = tpu.matmul %344, %345, %cst_55 {dimension_numbers = #tpu.dot_dimension_numbers<[1], [0], [0], [1], [0, 0, 1, 1], [], []>} : vector<2x32xf32>, vector<32x4xf32>, vector<2x4xf32> -> vector<2x4xf32>
    %c0_56 = arith.constant 0 : index
    %c0_57 = arith.constant 0 : index
    %347 = vector.load %arg9[%c0_56, %c0_57] : memref<1x4xf32, #tpu.memory_space<vmem>>, vector<1x4xf32>
    %348 = vector.broadcast %347 : vector<1x4xf32> to vector<2x4xf32>
    %349 = arith.addf %346, %348 : vector<2x4xf32>
    %c0_58 = arith.constant 0 : index
    %c0_59 = arith.constant 0 : index
    %350 = vector.load %arg10[%c0_58, %c0_59] : memref<2x4xf32, #tpu.memory_space<vmem>>, vector<2x4xf32>
    tpu.vector_store %arg10[%c0_58, %c0_59], %349 {strides = array<i32>} : memref<2x4xf32, #tpu.memory_space<vmem>>, vector<2x4xf32>,
    return
  }
  func.func @transform_0(%arg0: i32) -> (i32, i32) {
    %c0_i32 = arith.constant 0 : i32
    %c0_i32_0 = arith.constant 0 : i32
    %c0_i32_1 = arith.constant 0 : i32
    return %c0_i32, %c0_i32_0 : i32, i32
  }
  func.func @transform_1(%arg0: i32) -> (i32, i32) {
    %c0_i32 = arith.constant 0 : i32
    %c0_i32_0 = arith.constant 0 : i32
    %c0_i32_1 = arith.constant 0 : i32
    return %c0_i32, %c0_i32_0 : i32, i32
  }
  func.func @transform_2(%arg0: i32) -> (i32, i32) {
    %c0_i32 = arith.constant 0 : i32
    %c0_i32_0 = arith.constant 0 : i32
    %c0_i32_1 = arith.constant 0 : i32
    return %c0_i32, %c0_i32_0 : i32, i32
  }
  func.func @transform_3(%arg0: i32) -> (i32, i32) {
    %c0_i32 = arith.constant 0 : i32
    %c0_i32_0 = arith.constant 0 : i32
    %c0_i32_1 = arith.constant 0 : i32
    return %c0_i32, %c0_i32_0 : i32, i32
  }
  func.func @transform_4(%arg0: i32) -> (i32, i32) {
    %c0_i32 = arith.constant 0 : i32
    %c0_i32_0 = arith.constant 0 : i32
    %c0_i32_1 = arith.constant 0 : i32
    return %c0_i32, %c0_i32_0 : i32, i32
  }
  func.func @transform_5(%arg0: i32) -> (i32, i32) {
    %c0_i32 = arith.constant 0 : i32
    %c0_i32_0 = arith.constant 0 : i32
    %c0_i32_1 = arith.constant 0 : i32
    return %c0_i32, %c0_i32_0 : i32, i32
  }
  func.func @transform_6(%arg0: i32) -> (i32, i32) {
    %c0_i32 = arith.constant 0 : i32
    %c0_i32_0 = arith.constant 0 : i32
    %c0_i32_1 = arith.constant 0 : i32
    return %c0_i32, %c0_i32_0 : i32, i32
  }
  func.func @transform_7(%arg0: i32) -> (i32, i32) {
    %c0_i32 = arith.constant 0 : i32
    %c0_i32_0 = arith.constant 0 : i32
    %c0_i32_1 = arith.constant 0 : i32
    return %c0_i32, %c0_i32_0 : i32, i32
  }
  func.func @transform_8(%arg0: i32) -> (i32, i32) {
    %c0_i32 = arith.constant 0 : i32
    %c0_i32_0 = arith.constant 0 : i32
    %c0_i32_1 = arith.constant 0 : i32
    return %c0_i32, %c0_i32_0 : i32, i32
  }
  func.func @transform_9(%arg0: i32) -> (i32, i32) {
    %c0_i32 = arith.constant 0 : i32
    %c0_i32_0 = arith.constant 0 : i32
    %c0_i32_1 = arith.constant 0 : i32
    return %c0_i32, %c0_i32_0 : i32, i32
  }
}

</mosaic_0001>

<bundles_post_ra>
// kernel: lstm_model_forward.1
= control target key start
LH: loop header
LB: loop body
LE: loop exit
PB: predicated region body
PF: predicated region fallthrough
CT: control target
= control target key end

     0   :  { %vm68_vm0 = vcmask 1041408   ;;  %v2201_v2 = vmov 0.0   ;;  %vm2202_vm1 = vmmov 0   ;;  %vm64_vm2 = vcmask 31744   ;;  %s2630_s0 = inlined_call_operand.vmem [shape: f32[16,4], index: 0, kind: input, shape index: {}]   ;;  %s2631_s1 = inlined_call_operand.vmem [shape: bf16[4,128], index: 1, kind: input, shape index: {}]   ;;  %s2632_s2 = inlined_call_operand.vmem [shape: bf16[32,128], index: 2, kind: input, shape index: {}]   ;;  %s2633_s3 = inlined_call_operand.vmem [shape: f32[1,128], index: 3, kind: input, shape index: {}]   ;;  %s2634_s4 = inlined_call_operand.vmem [shape: bf16[32,128], index: 4, kind: input, shape index: {}]   ;;  %s2635_s5 = inlined_call_operand.vmem [shape: bf16[32,128], index: 5, kind: input, shape index: {}]   ;;  %s2636_s6 = inlined_call_operand.vmem [shape: f32[1,128], index: 6, kind: input, shape index: {}]   ;;  %s2637_s7 = inlined_call_operand.vmem [shape: f32[32,4], index: 7, kind: input, shape index: {}]   ;;  %s2638_s8 = inlined_call_operand.vmem [shape: f32[1,4], index: 8, kind: input, shape index: {}]   ;;  %s2639_s9 = inlined_call_operand.hbm [shape: f32[2,4], index: 9, kind: output, shape index: {}]  }
   0x1   :  { %v34_v0 = vld [vmem:[%s2631_s1] sm:$0x3]  ;;  %1802 = vmatprep.subr.bf16.mxu0 %v2201_v2  ;;  %1804 = vmatprep.mubr.msk.bf16.mxu0 %vm2202_vm1, %v2201_v2  ;;  %v56_v4 = vld [vmem:[%s2630_s0 + $0x8] sm:$0xff] }
   0x2   :  { %v55_v1 = vld [vmem:[%s2630_s0] sm:$0xff]  ;;  %v70_v3 = vsel %vm68_vm0, %v34_v0, 0  ;;  %1808 = vmatprep.subr.bf16.mxu1 %v2201_v2  ;;  %1812 = vmatprep.mubr.msk.bf16.mxu1 %vm2202_vm1, %v2201_v2 }
   0x3   :  { %1803 = vmatpush3.bf16.msra.mxu0 %v70_v3  ;;  %v57_v5 = vpack.c.bf16 %v56_v4, %v55_v1 }
   0x4   :  { %1816 = vmatprep.subr.bf16.mxu0 %v2201_v2 }
   0x6   :  { %1805 = vmatmul.mubr.msk.bf16.vlgmr.msra.gmra.mrb[0].mxu0 %vm64_vm2, %v57_v5 }
   0x7   :  { %1820 = vmatprep.mubr.msk.bf16.mxu0 %vm2202_vm1, %v2201_v2 }
   0x8   :  { %14 = vsyncpa [#allocation3], 0  ;;  %v1681_v6 = vld [vmem:[%s2633_s3] ss:$0 sm:$0xff]  ;;  %s2203_s0 = smov 32   ;;  %v2304_v25 = vld [vmem:[%s2632_s2 + $0x8] sm:$0xff]  }
   0x9   :  { %v2292_v23 = vld [vmem:[%s2632_s2] sm:$0xff]   ;;  %v2309_v26 = vld [vmem:[%s2634_s4 + $0x8] sm:$0xff]   ;;  %s2204_s2 = smov 64   ;;  %vm153_vm3 = vcmask 261120   ;;  %s2206_s3 = smov [#allocation2]   ;;  %vm1664_vm4 = vcmask 25600  }
   0xa   :  { %v2297_v24 = vld [vmem:[%s2634_s4] sm:$0xff]   ;;  %1809 = vmatpush3.bf16.msra.mxu1 %v2292_v23 }
   0xb   :  { %1817 = vmatpush3.bf16.msra.mxu0 %v2297_v24  ;;  %1810 = vmatprep.subr.bf16.mxu1 %v2201_v2  ;;  %v2336_v32 = vld [vmem:[%s2636_s6] ss:$0 sm:$0xff] }
   0xc   :  { %1818 = vmatprep.subr.bf16.mxu0 %v2201_v2 }
   0xe   :  { %1811 = vmatpush3.bf16.msra.mxu1 %v2304_v25 }
   0xf   :  { %1819 = vmatpush3.bf16.msra.mxu0 %v2309_v26  ;;  %1824 = vmatprep.subr.bf16.mxu1 %v2201_v2 }
  0x10   :  { %1832 = vmatprep.subr.bf16.mxu0 %v2201_v2 }
  0xd9   :  { %v106_v7 = vpop.f32.mrb[0].mxu0 }
  0xda   :  { %v2278_v8 = vadd.f32 %v1681_v6, %v106_v7  ;;  %v1806_v9 = vpop.f32.mrb[1].mxu0 }
  0xdb   :  { %v109_v10 = vpop.f32.mrb[2].mxu0 }
  0xdc   :  { %v2280_v11 = vadd.f32 %v1681_v6, %v109_v10  ;;  %v1807_v12 = vpop.f32.mrb[3].mxu0  ;;  %2048 = vtanh.f32 %v2278_v8  ;;  %v1683_v14 = vmul.f32 -1.442695, %v2278_v8 }
  0xde   :  { %2050 = vpow2.f32 %v1683_v14 }
  0xe6   :  { %v2049_v13 = vpop.eup %2048 }
  0xe7   :  { %122 = vrot.lane.b32.xlu0 %v2049_v13, %s2203_s0  ;;  %v2358_v13 = vld [vmem:[%s2635_s5] sm:$0xff]  }
  0xe8   :  { %v2051_v15 = vpop.eup %2050 }
  0xe9   :  { %v116_v16 = vadd.f32 1.0, %v2051_v15  ;;  %v2366_v15 = vld [vmem:[%s2635_s5 + $0x8] sm:$0xff]  }
  0xeb   :  { %2052 = vrcp.f32 %v116_v16 }
  0xf5   :  { %v2053_v17 = vpop.eup %2052 }
  0xf6   :  { %v120_v20 = vmul.f32 0.0, %v2053_v17 }
 0x159   :  { %v123_v18 = vpop.permute.xlu0 %122 }
 0x15a   :  { %v125_v19 = vmul.f32 %v2053_v17, %v123_v18 }
 0x15c   :  { %127 = vrot.lane.b32.xlu0 %v125_v19, %s2203_s0 }
 0x1ce   :  { %v128_v21 = vpop.permute.xlu0 %127 }
 0x1cf   :  { %v2286_v22 = vadd.f32 %v128_v21, %v120_v20 }
 0x1d1   :  { %2054 = vtanh.f32 %v2286_v22  ;;  %v209_v58 = vrot.slane %v2286_v22, 6 }
 0x1db   :  { %v2055_v27 = vpop.eup %2054 }
 0x1dc   :  { %133 = vrot.lane.b32.xlu1 %v2055_v27, %s2203_s0 }
 0x24e   :  { %v134_v28 = vpop.permute.xlu1 %133 }
 0x24f   :  { %v136_v29 = vmul.f32 %v2053_v17, %v134_v28 }
 0x251   :  { %v137_v30 = vpack.c.bf16 %v136_v29, %v136_v29 }
 0x253   :  { %139 = vrot.lane.b32.xlu1 %v137_v30, %s2204_s2 }
 0x2c5   :  { %v140_v31 = vpop.permute.xlu1 %139 }
 0x2c6   :  { %1813 = vmatmul.mubr.msk.bf16.vlgmr.msra.gmra.mrb[0].mxu1 %vm153_vm3, %v140_v31  ;;  %1821 = vmatmul.mubr.msk.bf16.vlgmr.msra.gmra.mrb[4].mxu0 %vm153_vm3, %v140_v31 }
 0x2c7   :  { %1825 = vmatpush3.bf16.msra.mxu1 %v2292_v23  ;;  %1833 = vmatpush3.bf16.msra.mxu0 %v2297_v24 }
 0x2c8   :  { %1826 = vmatprep.subr.bf16.mxu1 %v2201_v2  ;;  %1834 = vmatprep.subr.bf16.mxu0 %v2201_v2 }
 0x2c9   :  { %1828 = vmatprep.mubr.msk.bf16.mxu1 %vm2202_vm1, %v2201_v2  ;;  %1836 = vmatprep.mubr.msk.bf16.mxu0 %vm2202_vm1, %v2201_v2 }
 0x2cb   :  { %1827 = vmatpush3.bf16.msra.mxu1 %v2304_v25  ;;  %1835 = vmatpush3.bf16.msra.mxu0 %v2309_v26 }
 0x2cc   :  { %1840 = vmatprep.subr.bf16.mxu0 %v2201_v2  ;;  %1848 = vmatprep.subr.bf16.mxu1 %v2201_v2 }
 0x399   :  { %v191_v33 = vpop.f32.mrb[0].mxu1  ;;  %v274_v34 = vpop.f32.mrb[4].mxu0 }
 0x39a   :  { %v198_v35 = vrot.slane %v191_v33, 6  ;;  %v275_v36 = vadd.f32 %v2336_v32, %v274_v34  ;;  %v1814_v37 = vpop.f32.mrb[1].mxu1  ;;  %v1822_v38 = vpop.f32.mrb[5].mxu0 }
 0x39b   :  { %v194_v39 = vpop.f32.mrb[2].mxu1  ;;  %v277_v40 = vpop.f32.mrb[6].mxu0 }
 0x39c   :  { %v200_v41 = vadd.f32 %v198_v35, %v2278_v8  ;;  %2056 = vtanh.f32 %v275_v36  ;;  %v1815_v42 = vpop.f32.mrb[3].mxu1  ;;  %v1823_v43 = vpop.f32.mrb[7].mxu0  ;;  %v1691_v46 = vmul.f32 -1.442695, %v275_v36 }
 0x39e   :  { %2058 = vtanh.f32 %v200_v41  ;;  %v1687_v47 = vmul.f32 -1.442695, %v200_v41 }
 0x39f   :  { %2060 = vpow2.f32 %v1691_v46 }
 0x3a0   :  { %2062 = vpow2.f32 %v1687_v47 }
 0x3a6   :  { %v2057_v44 = vpop.eup %2056 }
 0x3a7   :  { %289 = vrot.lane.b32.xlu1 %v2057_v44, %s2203_s0 }
 0x3a8   :  { %v2059_v45 = vpop.eup %2058 }
 0x3a9   :  { %213 = vrot.lane.b32.xlu0 %v2059_v45, %s2203_s0  ;;  %v2061_v48 = vpop.eup %2060 }
 0x3aa   :  { %v2063_v49 = vpop.eup %2062  ;;  %v283_v50 = vadd.f32 1.0, %v2061_v48 }
 0x3ab   :  { %v204_v51 = vadd.f32 1.0, %v2063_v49 }
 0x3ac   :  { %2064 = vrcp.f32 %v283_v50 }
 0x3ad   :  { %2066 = vrcp.f32 %v204_v51 }
 0x3b6   :  { %v2065_v52 = vpop.eup %2064 }
 0x3b7   :  { %v2067_v55 = vpop.eup %2066  ;;  %v287_v59 = vmul.f32 0.0, %v2065_v52 }
 0x3b8   :  { %v211_v62 = vmul.f32 %v2067_v55, %v209_v58 }
 0x419   :  { %v290_v53 = vpop.permute.xlu1 %289 }
 0x41a   :  { %v292_v54 = vmul.f32 %v2065_v52, %v290_v53 }
 0x41b   :  { %v214_v56 = vpop.permute.xlu0 %213 }
 0x41c   :  { %v216_v57 = vmul.f32 %v2067_v55, %v214_v56  ;;  %294 = vrot.lane.b32.xlu1 %v292_v54, %s2203_s0 }
 0x41e   :  { %218 = vrot.lane.b32.xlu0 %v216_v57, %s2203_s0 }
 0x48e   :  { %v295_v60 = vpop.permute.xlu1 %294 }
 0x48f   :  { %v2345_v61 = vadd.f32 %v295_v60, %v287_v59 }
 0x490   :  { %v219_v63 = vpop.permute.xlu0 %218 }
 0x491   :  { %2068 = vtanh.f32 %v2345_v61  ;;  %v2348_v0 = vadd.f32 %v219_v63, %v211_v62 }
 0x493   :  { %2070 = vtanh.f32 %v2348_v0  ;;  %v364_v47 = vrot.slane %v2348_v0, 6 }
 0x49b   :  { %v2069_v1 = vpop.eup %2068 }
 0x49c   :  { %300 = vrot.lane.b32.xlu1 %v2069_v1, %s2203_s0 }
 0x49d   :  { %v2071_v3 = vpop.eup %2070 }
 0x49e   :  { %224 = vrot.lane.b32.xlu0 %v2071_v3, %s2203_s0 }
 0x50e   :  { %v301_v4 = vpop.permute.xlu1 %300 }
 0x50f   :  { %v303_v5 = vmul.f32 %v2065_v52, %v301_v4 }
 0x510   :  { %v225_v6 = vpop.permute.xlu0 %224 }
 0x511   :  { %v423_v7 = vpack.c.bf16 %v303_v5, %v303_v5  ;;  %v227_v9 = vmul.f32 %v2067_v55, %v225_v6 }
 0x513   :  { %v304_v10 = vpack.c.bf16 %v227_v9, %v227_v9  ;;  %425 = vrot.lane.b32.xlu1 %v423_v7, %s2204_s2 }
 0x515   :  { %v306_v12 = vrot.slane %v304_v10, 1 }
 0x517   :  { %307 = vrot.lane.b32.xlu0 %v306_v12, %s2204_s2 }
 0x585   :  { %v426_v16 = vpop.permute.xlu1 %425 }
 0x589   :  { %v308_v14 = vpop.permute.xlu0 %307 }
 0x58a   :  { %1829 = vmatmul.mubr.msk.bf16.vlgmr.msra.gmra.mrb[4].mxu1 %vm153_vm3, %v308_v14  ;;  %1837 = vmatmul.mubr.msk.bf16.vlgmr.msra.gmra.mrb[8].mxu0 %vm153_vm3, %v308_v14 }
 0x58b   :  { %1841 = vmatpush3.bf16.msra.mxu0 %v2358_v13  ;;  %1844 = vmatprep.mubr.msk.bf16.mxu0 %vm2202_vm1, %v2201_v2 }
 0x58c   :  { %1842 = vmatprep.subr.bf16.mxu0 %v2201_v2  ;;  %1849 = vmatpush3.bf16.msra.mxu1 %v2292_v23 }
 0x58d   :  { %1850 = vmatprep.subr.bf16.mxu1 %v2201_v2  ;;  %1852 = vmatprep.mubr.msk.bf16.mxu1 %vm2202_vm1, %v2201_v2 }
 0x58f   :  { %1843 = vmatpush3.bf16.msra.mxu0 %v2366_v15 }
 0x590   :  { %1851 = vmatpush3.bf16.msra.mxu1 %v2304_v25  ;;  %1872 = vmatprep.subr.bf16.mxu0 %v2201_v2 }
 0x591   :  { %1856 = vmatprep.subr.bf16.mxu1 %v2201_v2 }
 0x596   :  { %1845 = vmatmul.mubr.msk.bf16.vlgmr.msra.gmra.mrb[8].mxu0 %vm153_vm3, %v426_v16 }
 0x597   :  { %1873 = vmatpush3.bf16.msra.mxu0 %v2292_v23  ;;  %1876 = vmatprep.mubr.msk.bf16.mxu0 %vm2202_vm1, %v2201_v2 }
 0x598   :  { %1874 = vmatprep.subr.bf16.mxu0 %v2201_v2 }
 0x59b   :  { %1875 = vmatpush3.bf16.msra.mxu0 %v2304_v25 }
 0x59c   :  { %1880 = vmatprep.subr.bf16.mxu0 %v2201_v2 }
 0x65d   :  { %v346_v17 = vpop.f32.mrb[4].mxu1 }
 0x65e   :  { %v353_v18 = vrot.slane %v346_v17, 4  ;;  %v1830_v19 = vpop.f32.mrb[5].mxu1 }
 0x65f   :  { %v349_v20 = vpop.f32.mrb[6].mxu1 }
 0x660   :  { %v355_v21 = vadd.f32 %v353_v18, %v2278_v8  ;;  %v1831_v22 = vpop.f32.mrb[7].mxu1 }
 0x662   :  { %2072 = vtanh.f32 %v355_v21  ;;  %v1693_v35 = vmul.f32 -1.442695, %v355_v21 }
 0x669   :  { %v476_v27 = vpop.f32.mrb[8].mxu0 }
 0x66a   :  { %v2001_v28 = vadd.f32 %v2336_v32, %v476_v27  ;;  %v1846_v29 = vpop.f32.mrb[9].mxu0 }
 0x66b   :  { %v479_v30 = vpop.f32.mrb[10].mxu0 }
 0x66c   :  { %v2073_v31 = vpop.eup %2072  ;;  %2074 = vtanh.f32 %v2001_v28  ;;  %v1847_v33 = vpop.f32.mrb[11].mxu0  ;;  %v1698_v36 = vmul.f32 -1.442695, %v2001_v28 }
 0x66d   :  { %368 = vrot.lane.b32.xlu0 %v2073_v31, %s2203_s0  ;;  %2076 = vpow2.f32 %v1693_v35 }
 0x66e   :  { %2078 = vpow2.f32 %v1698_v36 }
 0x676   :  { %v2075_v34 = vpop.eup %2074 }
 0x677   :  { %492 = vrot.lane.b32.xlu1 %v2075_v34, %s2203_s0  ;;  %v2077_v37 = vpop.eup %2076 }
 0x678   :  { %v359_v38 = vadd.f32 1.0, %v2077_v37  ;;  %v2079_v39 = vpop.eup %2078 }
 0x679   :  { %v486_v40 = vadd.f32 1.0, %v2079_v39 }
 0x67a   :  { %2080 = vrcp.f32 %v359_v38 }
 0x67b   :  { %2082 = vrcp.f32 %v486_v40 }
 0x684   :  { %v2081_v41 = vpop.eup %2080 }
 0x685   :  { %v2083_v44 = vpop.eup %2082  ;;  %v366_v48 = vmul.f32 %v2081_v41, %v364_v47 }
 0x686   :  { %v490_v51 = vmul.f32 %v2083_v44, %v2345_v61 }
 0x6df   :  { %v369_v42 = vpop.permute.xlu0 %368 }
 0x6e0   :  { %v371_v43 = vmul.f32 %v2081_v41, %v369_v42 }
 0x6e2   :  { %373 = vrot.lane.b32.xlu0 %v371_v43, %s2203_s0 }
 0x6e9   :  { %v493_v45 = vpop.permute.xlu1 %492 }
 0x6ea   :  { %v495_v46 = vmul.f32 %v2083_v44, %v493_v45 }
 0x6ec   :  { %497 = vrot.lane.b32.xlu1 %v495_v46, %s2203_s0 }
 0x754   :  { %v374_v49 = vpop.permute.xlu0 %373 }
 0x755   :  { %v2393_v50 = vadd.f32 %v374_v49, %v366_v48 }
 0x757   :  { %2084 = vtanh.f32 %v2393_v50  ;;  %v567_v35 = vrot.slane %v2393_v50, 6 }
 0x75e   :  { %v498_v52 = vpop.permute.xlu1 %497 }
 0x75f   :  { %v2397_v53 = vadd.f32 %v498_v52, %v490_v51 }
 0x761   :  { %v2085_v54 = vpop.eup %2084  ;;  %2086 = vtanh.f32 %v2397_v53 }
 0x762   :  { %379 = vrot.lane.b32.xlu0 %v2085_v54, %s2203_s0 }
 0x76b   :  { %v2087_v55 = vpop.eup %2086 }
 0x76c   :  { %503 = vrot.lane.b32.xlu1 %v2087_v55, %s2203_s0 }
 0x7d4   :  { %v380_v56 = vpop.permute.xlu0 %379 }
 0x7d5   :  { %v382_v57 = vmul.f32 %v2081_v41, %v380_v56 }
 0x7d7   :  { %v507_v58 = vpack.c.bf16 %v382_v57, %v382_v57 }
 0x7d9   :  { %v509_v59 = vrot.slane %v507_v58, 2 }
 0x7db   :  { %510 = vrot.lane.b32.xlu0 %v509_v59, %s2204_s2 }
 0x7de   :  { %v504_v60 = vpop.permute.xlu1 %503 }
 0x7df   :  { %v506_v62 = vmul.f32 %v2083_v44, %v504_v60 }
 0x7e1   :  { %v626_v61 = vpack.c.bf16 %v506_v62, %v506_v62 }
 0x7e3   :  { %628 = vrot.lane.b32.xlu1 %v626_v61, %s2204_s2 }
 0x84d   :  { %v511_v63 = vpop.permute.xlu0 %510 }
 0x84e   :  { %1853 = vmatmul.mubr.msk.bf16.vlgmr.msra.gmra.mrb[8].mxu1 %vm153_vm3, %v511_v63 }
 0x84f   :  { %1857 = vmatpush3.bf16.msra.mxu1 %v2297_v24  ;;  %1860 = vmatprep.mubr.msk.bf16.mxu1 %vm2202_vm1, %v2201_v2 }
 0x850   :  { %1858 = vmatprep.subr.bf16.mxu1 %v2201_v2 }
 0x853   :  { %1859 = vmatpush3.bf16.msra.mxu1 %v2309_v26 }
 0x854   :  { %1864 = vmatprep.subr.bf16.mxu1 %v2201_v2 }
 0x855   :  { %v629_v0 = vpop.permute.xlu1 %628 }
 0x856   :  { %1861 = vmatmul.mubr.msk.bf16.vlgmr.msra.gmra.mrb[12].mxu1 %vm153_vm3, %v511_v63 }
 0x857   :  { %1865 = vmatpush3.bf16.msra.mxu1 %v2358_v13  ;;  %1868 = vmatprep.mubr.msk.bf16.mxu1 %vm2202_vm1, %v2201_v2 }
 0x858   :  { %1866 = vmatprep.subr.bf16.mxu1 %v2201_v2 }
 0x85b   :  { %1867 = vmatpush3.bf16.msra.mxu1 %v2366_v15 }
 0x85c   :  { %1896 = vmatprep.subr.bf16.mxu1 %v2201_v2 }
 0x862   :  { %1869 = vmatmul.mubr.msk.bf16.vlgmr.msra.gmra.mrb[12].mxu1 %vm153_vm3, %v629_v0 }
 0x863   :  { %1897 = vmatpush3.bf16.msra.mxu1 %v2292_v23  ;;  %1900 = vmatprep.mubr.msk.bf16.mxu1 %vm2202_vm1, %v2201_v2 }
 0x864   :  { %1898 = vmatprep.subr.bf16.mxu1 %v2201_v2 }
 0x867   :  { %1899 = vmatpush3.bf16.msra.mxu1 %v2304_v25 }
 0x868   :  { %1904 = vmatprep.subr.bf16.mxu1 %v2201_v2 }
 0x921   :  { %v549_v1 = vpop.f32.mrb[8].mxu1 }
 0x922   :  { %v556_v3 = vrot.slane %v549_v1, 2  ;;  %v1854_v4 = vpop.f32.mrb[9].mxu1 }
 0x923   :  { %v552_v5 = vpop.f32.mrb[10].mxu1 }
 0x924   :  { %v558_v6 = vadd.f32 %v556_v3, %v2278_v8  ;;  %v1855_v7 = vpop.f32.mrb[11].mxu1 }
 0x926   :  { %2088 = vtanh.f32 %v558_v6  ;;  %v1700_v19 = vmul.f32 -1.442695, %v558_v6 }
 0x930   :  { %v2089_v9 = vpop.eup %2088 }
 0x931   :  { %571 = vrot.lane.b32.xlu0 %v2089_v9, %s2203_s0 }
 0x935   :  { %v667_v10 = vpop.f32.mrb[12].mxu1 }
 0x936   :  { %v2002_v12 = vadd.f32 %v2336_v32, %v667_v10  ;;  %v1870_v14 = vpop.f32.mrb[13].mxu1 }
 0x937   :  { %v670_v16 = vpop.f32.mrb[14].mxu1 }
 0x938   :  { %2090 = vtanh.f32 %v2002_v12  ;;  %v1871_v17 = vpop.f32.mrb[15].mxu1  ;;  %v1703_v8 = vmul.f32 -1.442695, %v2002_v12 }
 0x939   :  { %2092 = vpow2.f32 %v1700_v19 }
 0x942   :  { %v2091_v18 = vpop.eup %2090 }
 0x943   :  { %683 = vrot.lane.b32.xlu1 %v2091_v18, %s2203_s0  ;;  %v2093_v20 = vpop.eup %2092 }
 0x944   :  { %v562_v21 = vadd.f32 1.0, %v2093_v20 }
 0x946   :  { %2094 = vrcp.f32 %v562_v21 }
 0x947   :  { %2096 = vpow2.f32 %v1703_v8 }
 0x950   :  { %v2095_v22 = vpop.eup %2094 }
 0x951   :  { %v2097_v28 = vpop.eup %2096  ;;  %v569_v36 = vmul.f32 %v2095_v22, %v567_v35 }
 0x952   :  { %v677_v30 = vadd.f32 1.0, %v2097_v28 }
 0x954   :  { %2098 = vrcp.f32 %v677_v30 }
 0x95e   :  { %v2099_v31 = vpop.eup %2098 }
 0x95f   :  { %v681_v40 = vmul.f32 %v2099_v31, %v2397_v53 }
 0x9a3   :  { %v572_v27 = vpop.permute.xlu0 %571 }
 0x9a4   :  { %v574_v29 = vmul.f32 %v2095_v22, %v572_v27 }
 0x9a6   :  { %576 = vrot.lane.b32.xlu0 %v574_v29, %s2203_s0 }
 0x9b5   :  { %v684_v33 = vpop.permute.xlu1 %683 }
 0x9b6   :  { %v686_v34 = vmul.f32 %v2099_v31, %v684_v33 }
 0x9b8   :  { %688 = vrot.lane.b32.xlu1 %v686_v34, %s2203_s0 }
 0xa18   :  { %v577_v37 = vpop.permute.xlu0 %576 }
 0xa19   :  { %v2432_v38 = vadd.f32 %v577_v37, %v569_v36 }
 0xa1b   :  { %2100 = vtanh.f32 %v2432_v38  ;;  %v755_v18 = vrot.slane %v2432_v38, 6 }
 0xa25   :  { %v2101_v39 = vpop.eup %2100 }
 0xa26   :  { %582 = vrot.lane.b32.xlu0 %v2101_v39, %s2203_s0 }
 0xa2a   :  { %v689_v41 = vpop.permute.xlu1 %688 }
 0xa2b   :  { %v2437_v42 = vadd.f32 %v689_v41, %v681_v40 }
 0xa2d   :  { %2102 = vtanh.f32 %v2437_v42 }
 0xa37   :  { %v2103_v43 = vpop.eup %2102 }
 0xa38   :  { %694 = vrot.lane.b32.xlu1 %v2103_v43, %s2203_s0 }
 0xa98   :  { %v583_v44 = vpop.permute.xlu0 %582 }
 0xa99   :  { %v585_v45 = vmul.f32 %v2095_v22, %v583_v44 }
 0xa9b   :  { %v698_v46 = vpack.c.bf16 %v585_v45, %v585_v45 }
 0xa9d   :  { %v700_v47 = vrot.slane %v698_v46, 3 }
 0xa9f   :  { %701 = vrot.lane.b32.xlu0 %v700_v47, %s2204_s2 }
 0xaaa   :  { %v695_v48 = vpop.permute.xlu1 %694 }
 0xaab   :  { %v697_v49 = vmul.f32 %v2099_v31, %v695_v48 }
 0xaad   :  { %v814_v50 = vpack.c.bf16 %v697_v49, %v697_v49 }
 0xaaf   :  { %816 = vrot.lane.b32.xlu1 %v814_v50, %s2204_s2 }
 0xb11   :  { %v702_v51 = vpop.permute.xlu0 %701 }
 0xb12   :  { %1877 = vmatmul.mubr.msk.bf16.vlgmr.msra.gmra.mrb[12].mxu0 %vm153_vm3, %v702_v51 }
 0xb13   :  { %1881 = vmatpush3.bf16.msra.mxu0 %v2297_v24  ;;  %1884 = vmatprep.mubr.msk.bf16.mxu0 %vm2202_vm1, %v2201_v2 }
 0xb14   :  { %1882 = vmatprep.subr.bf16.mxu0 %v2201_v2 }
 0xb17   :  { %1883 = vmatpush3.bf16.msra.mxu0 %v2309_v26 }
 0xb18   :  { %1888 = vmatprep.subr.bf16.mxu0 %v2201_v2 }
 0xb1a   :  { %1885 = vmatmul.mubr.msk.bf16.vlgmr.msra.gmra.mrb[16].mxu0 %vm153_vm3, %v702_v51 }
 0xb1b   :  { %1889 = vmatpush3.bf16.msra.mxu0 %v2358_v13  ;;  %1892 = vmatprep.mubr.msk.bf16.mxu0 %vm2202_vm1, %v2201_v2 }
 0xb1c   :  { %1890 = vmatprep.subr.bf16.mxu0 %v2201_v2 }
 0xb1f   :  { %1891 = vmatpush3.bf16.msra.mxu0 %v2366_v15 }
 0xb20   :  { %1920 = vmatprep.subr.bf16.mxu0 %v2201_v2 }
 0xb21   :  { %v817_v52 = vpop.permute.xlu1 %816 }
 0xb26   :  { %1893 = vmatmul.mubr.msk.bf16.vlgmr.msra.gmra.mrb[16].mxu0 %vm153_vm3, %v817_v52 }
 0xb27   :  { %1921 = vmatpush3.bf16.msra.mxu0 %v2292_v23  ;;  %1924 = vmatprep.mubr.msk.bf16.mxu0 %vm2202_vm1, %v2201_v2 }
 0xb28   :  { %1922 = vmatprep.subr.bf16.mxu0 %v2201_v2 }
 0xb2b   :  { %1923 = vmatpush3.bf16.msra.mxu0 %v2304_v25 }
 0xb2c   :  { %1928 = vmatprep.subr.bf16.mxu0 %v2201_v2 }
 0xbe5   :  { %v740_v53 = vpop.f32.mrb[12].mxu0 }
 0xbe6   :  { %v746_v54 = vadd.f32 %v740_v53, %v2280_v11  ;;  %v1878_v55 = vpop.f32.mrb[13].mxu0 }
 0xbe7   :  { %v743_v56 = vpop.f32.mrb[14].mxu0 }
 0xbe8   :  { %2104 = vtanh.f32 %v746_v54  ;;  %v1879_v57 = vpop.f32.mrb[15].mxu0  ;;  %v1705_v1 = vmul.f32 -1.442695, %v746_v54 }
 0xbf2   :  { %v2105_v58 = vpop.eup %2104 }
 0xbf3   :  { %759 = vrot.lane.b32.xlu0 %v2105_v58, %s2203_s0 }
 0xbf9   :  { %v855_v59 = vpop.f32.mrb[16].mxu0 }
 0xbfa   :  { %v2003_v60 = vadd.f32 %v2336_v32, %v855_v59  ;;  %v1894_v62 = vpop.f32.mrb[17].mxu0 }
 0xbfb   :  { %v858_v61 = vpop.f32.mrb[18].mxu0 }
 0xbfc   :  { %2106 = vtanh.f32 %v2003_v60  ;;  %v1895_v63 = vpop.f32.mrb[19].mxu0  ;;  %v1708_v5 = vmul.f32 -1.442695, %v2003_v60 }
 0xbfd   :  { %2108 = vpow2.f32 %v1705_v1 }
 0xc06   :  { %v2107_v0 = vpop.eup %2106 }
 0xc07   :  { %871 = vrot.lane.b32.xlu1 %v2107_v0, %s2203_s0  ;;  %v2109_v3 = vpop.eup %2108 }
 0xc08   :  { %v750_v4 = vadd.f32 1.0, %v2109_v3 }
 0xc0a   :  { %2110 = vrcp.f32 %v750_v4 }
 0xc0b   :  { %2112 = vpow2.f32 %v1708_v5 }
 0xc14   :  { %v2111_v6 = vpop.eup %2110 }
 0xc15   :  { %v2113_v10 = vpop.eup %2112  ;;  %v757_v19 = vmul.f32 %v2111_v6, %v755_v18 }
 0xc16   :  { %v865_v12 = vadd.f32 1.0, %v2113_v10 }
 0xc18   :  { %2114 = vrcp.f32 %v865_v12 }
 0xc22   :  { %v2115_v14 = vpop.eup %2114 }
 0xc23   :  { %v869_v22 = vmul.f32 %v2115_v14, %v2437_v42 }
 0xc65   :  { %v760_v7 = vpop.permute.xlu0 %759 }
 0xc66   :  { %v762_v9 = vmul.f32 %v2111_v6, %v760_v7 }
 0xc68   :  { %764 = vrot.lane.b32.xlu0 %v762_v9, %s2203_s0 }
 0xc79   :  { %v872_v16 = vpop.permute.xlu1 %871 }
 0xc7a   :  { %v874_v17 = vmul.f32 %v2115_v14, %v872_v16 }
 0xc7c   :  { %876 = vrot.lane.b32.xlu1 %v874_v17, %s2203_s0 }
 0xcda   :  { %v765_v20 = vpop.permute.xlu0 %764 }
 0xcdb   :  { %v2471_v21 = vadd.f32 %v765_v20, %v757_v19 }
 0xcdd   :  { %2116 = vtanh.f32 %v2471_v21  ;;  %v945_v61 = vrot.slane %v2471_v21, 6 }
 0xce7   :  { %v2117_v8 = vpop.eup %2116 }
 0xce8   :  { %770 = vrot.lane.b32.xlu0 %v2117_v8, %s2203_s0 }
 0xcee   :  { %v877_v27 = vpop.permute.xlu1 %876 }
 0xcef   :  { %v2476_v28 = vadd.f32 %v877_v27, %v869_v22 }
 0xcf1   :  { %2118 = vtanh.f32 %v2476_v28 }
 0xcfb   :  { %v2119_v29 = vpop.eup %2118 }
 0xcfc   :  { %882 = vrot.lane.b32.xlu1 %v2119_v29, %s2203_s0 }
 0xd5a   :  { %v771_v30 = vpop.permute.xlu0 %770 }
 0xd5b   :  { %v773_v31 = vmul.f32 %v2111_v6, %v771_v30 }
 0xd5d   :  { %v886_v33 = vpack.c.bf16 %v773_v31, %v773_v31 }
 0xd5f   :  { %888 = vrot.lane.b32.xlu0 %v886_v33, %s2204_s2 }
 0xd6e   :  { %v883_v34 = vpop.permute.xlu1 %882 }
 0xd6f   :  { %v885_v35 = vmul.f32 %v2115_v14, %v883_v34 }
 0xd71   :  { %v1004_v36 = vpack.c.bf16 %v885_v35, %v885_v35 }
 0xd73   :  { %1006 = vrot.lane.b32.xlu1 %v1004_v36, %s2204_s2 }
 0xdd1   :  { %v889_v37 = vpop.permute.xlu0 %888 }
 0xdd2   :  { %1901 = vmatmul.mubr.msk.bf16.vlgmr.msra.gmra.mrb[16].mxu1 %vm153_vm3, %v889_v37 }
 0xdd3   :  { %1905 = vmatpush3.bf16.msra.mxu1 %v2297_v24  ;;  %1908 = vmatprep.mubr.msk.bf16.mxu1 %vm2202_vm1, %v2201_v2 }
 0xdd4   :  { %1906 = vmatprep.subr.bf16.mxu1 %v2201_v2 }
 0xdd7   :  { %1907 = vmatpush3.bf16.msra.mxu1 %v2309_v26 }
 0xdd8   :  { %1912 = vmatprep.subr.bf16.mxu1 %v2201_v2 }
 0xdda   :  { %1909 = vmatmul.mubr.msk.bf16.vlgmr.msra.gmra.mrb[20].mxu1 %vm153_vm3, %v889_v37 }
 0xddb   :  { %1913 = vmatpush3.bf16.msra.mxu1 %v2358_v13  ;;  %1916 = vmatprep.mubr.msk.bf16.mxu1 %vm2202_vm1, %v2201_v2 }
 0xddc   :  { %1914 = vmatprep.subr.bf16.mxu1 %v2201_v2 }
 0xddf   :  { %1915 = vmatpush3.bf16.msra.mxu1 %v2366_v15 }
 0xde0   :  { %1944 = vmatprep.subr.bf16.mxu1 %v2201_v2 }
 0xde5   :  { %v1007_v38 = vpop.permute.xlu1 %1006 }
 0xde6   :  { %1917 = vmatmul.mubr.msk.bf16.vlgmr.msra.gmra.mrb[20].mxu1 %vm153_vm3, %v1007_v38 }
 0xde7   :  { %1945 = vmatpush3.bf16.msra.mxu1 %v2292_v23  ;;  %1948 = vmatprep.mubr.msk.bf16.mxu1 %vm2202_vm1, %v2201_v2 }
 0xde8   :  { %1946 = vmatprep.subr.bf16.mxu1 %v2201_v2 }
 0xdeb   :  { %1947 = vmatpush3.bf16.msra.mxu1 %v2304_v25 }
 0xdec   :  { %1952 = vmatprep.subr.bf16.mxu1 %v2201_v2 }
 0xea5   :  { %v927_v39 = vpop.f32.mrb[16].mxu1 }
 0xea6   :  { %v934_v40 = vrot.slane %v927_v39, 6  ;;  %v1902_v41 = vpop.f32.mrb[17].mxu1 }
 0xea7   :  { %v930_v42 = vpop.f32.mrb[18].mxu1 }
 0xea8   :  { %v936_v43 = vadd.f32 %v934_v40, %v2280_v11  ;;  %v1903_v44 = vpop.f32.mrb[19].mxu1 }
 0xeaa   :  { %2120 = vtanh.f32 %v936_v43  ;;  %v1710_v50 = vmul.f32 -1.442695, %v936_v43 }
 0xeb4   :  { %v2121_v45 = vpop.eup %2120 }
 0xeb5   :  { %949 = vrot.lane.b32.xlu0 %v2121_v45, %s2203_s0 }
 0xeb9   :  { %v1045_v23 = vpop.f32.mrb[20].mxu1 }
 0xeba   :  { %v2004_v46 = vadd.f32 %v2336_v32, %v1045_v23  ;;  %v1918_v47 = vpop.f32.mrb[21].mxu1 }
 0xebb   :  { %v1048_v48 = vpop.f32.mrb[22].mxu1 }
 0xebc   :  { %2122 = vtanh.f32 %v2004_v46  ;;  %v1919_v25 = vpop.f32.mrb[23].mxu1  ;;  %v1713_v53 = vmul.f32 -1.442695, %v2004_v46 }
 0xebd   :  { %2124 = vpow2.f32 %v1710_v50 }
 0xec6   :  { %v2123_v49 = vpop.eup %2122 }
 0xec7   :  { %1061 = vrot.lane.b32.xlu1 %v2123_v49, %s2203_s0  ;;  %v2125_v51 = vpop.eup %2124 }
 0xec8   :  { %v940_v52 = vadd.f32 1.0, %v2125_v51 }
 0xeca   :  { %2126 = vrcp.f32 %v940_v52 }
 0xecb   :  { %2128 = vpow2.f32 %v1713_v53 }
 0xed4   :  { %v2127_v54 = vpop.eup %2126 }
 0xed5   :  { %v2129_v56 = vpop.eup %2128  ;;  %v947_v63 = vmul.f32 %v2127_v54, %v945_v61 }
 0xed6   :  { %v1055_v58 = vadd.f32 1.0, %v2129_v56 }
 0xed8   :  { %2130 = vrcp.f32 %v1055_v58 }
 0xee2   :  { %v2131_v59 = vpop.eup %2130 }
 0xee3   :  { %v1059_v4 = vmul.f32 %v2131_v59, %v2476_v28 }
 0xf27   :  { %v950_v55 = vpop.permute.xlu0 %949 }
 0xf28   :  { %v952_v57 = vmul.f32 %v2127_v54, %v950_v55 }
 0xf2a   :  { %954 = vrot.lane.b32.xlu0 %v952_v57, %s2203_s0 }
 0xf39   :  { %v1062_v60 = vpop.permute.xlu1 %1061 }
 0xf3a   :  { %v1064_v62 = vmul.f32 %v2131_v59, %v1062_v60 }
 0xf3c   :  { %1066 = vrot.lane.b32.xlu1 %v1064_v62, %s2203_s0 }
 0xf9c   :  { %v955_v0 = vpop.permute.xlu0 %954 }
 0xf9d   :  { %v2510_v1 = vadd.f32 %v955_v0, %v947_v63 }
 0xf9f   :  { %2132 = vtanh.f32 %v2510_v1  ;;  %v1136_v25 = vrot.slane %v2510_v1, 6 }
 0xfa9   :  { %v2133_v3 = vpop.eup %2132 }
 0xfaa   :  { %960 = vrot.lane.b32.xlu0 %v2133_v3, %s2203_s0 }
 0xfae   :  { %v1067_v5 = vpop.permute.xlu1 %1066 }
 0xfaf   :  { %v2515_v6 = vadd.f32 %v1067_v5, %v1059_v4 }
 0xfb1   :  { %2134 = vtanh.f32 %v2515_v6 }
 0xfbb   :  { %v2135_v7 = vpop.eup %2134 }
 0xfbc   :  { %1072 = vrot.lane.b32.xlu1 %v2135_v7, %s2203_s0 }
0x101c   :  { %v961_v9 = vpop.permute.xlu0 %960 }
0x101d   :  { %v963_v10 = vmul.f32 %v2127_v54, %v961_v9 }
0x101f   :  { %v1076_v12 = vpack.c.bf16 %v963_v10, %v963_v10 }
0x1021   :  { %v1078_v14 = vrot.slane %v1076_v12, 1 }
0x1023   :  { %1079 = vrot.lane.b32.xlu0 %v1078_v14, %s2204_s2 }
0x102e   :  { %v1073_v16 = vpop.permute.xlu1 %1072 }
0x102f   :  { %v1075_v17 = vmul.f32 %v2131_v59, %v1073_v16 }
0x1031   :  { %v1195_v18 = vpack.c.bf16 %v1075_v17, %v1075_v17 }
0x1033   :  { %1197 = vrot.lane.b32.xlu1 %v1195_v18, %s2204_s2 }
0x1095   :  { %v1080_v19 = vpop.permute.xlu0 %1079 }
0x1096   :  { %1925 = vmatmul.mubr.msk.bf16.vlgmr.msra.gmra.mrb[20].mxu0 %vm153_vm3, %v1080_v19 }
0x1097   :  { %1929 = vmatpush3.bf16.msra.mxu0 %v2297_v24  ;;  %1932 = vmatprep.mubr.msk.bf16.mxu0 %vm2202_vm1, %v2201_v2 }
0x1098   :  { %1930 = vmatprep.subr.bf16.mxu0 %v2201_v2 }
0x109b   :  { %1931 = vmatpush3.bf16.msra.mxu0 %v2309_v26 }
0x109c   :  { %1936 = vmatprep.subr.bf16.mxu0 %v2201_v2 }
0x109e   :  { %1933 = vmatmul.mubr.msk.bf16.vlgmr.msra.gmra.mrb[24].mxu0 %vm153_vm3, %v1080_v19 }
0x109f   :  { %1937 = vmatpush3.bf16.msra.mxu0 %v2358_v13  ;;  %1940 = vmatprep.mubr.msk.bf16.mxu0 %vm2202_vm1, %v2201_v2 }
0x10a0   :  { %1938 = vmatprep.subr.bf16.mxu0 %v2201_v2 }
0x10a3   :  { %1939 = vmatpush3.bf16.msra.mxu0 %v2366_v15 }
0x10a4   :  { %1968 = vmatprep.subr.bf16.mxu0 %v2201_v2 }
0x10a5   :  { %v1198_v20 = vpop.permute.xlu1 %1197 }
0x10aa   :  { %1941 = vmatmul.mubr.msk.bf16.vlgmr.msra.gmra.mrb[24].mxu0 %vm153_vm3, %v1198_v20 }
0x10ab   :  { %1969 = vmatpush3.bf16.msra.mxu0 %v2297_v24  ;;  %1972 = vmatprep.mubr.msk.bf16.mxu0 %vm2202_vm1, %v2201_v2 }
0x10ac   :  { %1970 = vmatprep.subr.bf16.mxu0 %v2201_v2 }
0x10af   :  { %1971 = vmatpush3.bf16.msra.mxu0 %v2309_v26 }
0x10b0   :  { %1976 = vmatprep.subr.bf16.mxu0 %v2201_v2 }
0x1169   :  { %v1118_v21 = vpop.f32.mrb[20].mxu0 }
0x116a   :  { %v1125_v8 = vrot.slane %v1118_v21, 4  ;;  %v1926_v22 = vpop.f32.mrb[21].mxu0 }
0x116b   :  { %v1121_v27 = vpop.f32.mrb[22].mxu0 }
0x116c   :  { %v1127_v28 = vadd.f32 %v1125_v8, %v2280_v11  ;;  %v1927_v29 = vpop.f32.mrb[23].mxu0 }
0x116e   :  { %2136 = vtanh.f32 %v1127_v28  ;;  %v1715_v38 = vmul.f32 -1.442695, %v1127_v28 }
0x1178   :  { %v2137_v30 = vpop.eup %2136 }
0x1179   :  { %1140 = vrot.lane.b32.xlu0 %v2137_v30, %s2203_s0 }
0x117d   :  { %v1236_v31 = vpop.f32.mrb[24].mxu0 }
0x117e   :  { %v2005_v33 = vadd.f32 %v2336_v32, %v1236_v31  ;;  %v1942_v34 = vpop.f32.mrb[25].mxu0 }
0x117f   :  { %v1239_v35 = vpop.f32.mrb[26].mxu0 }
0x1180   :  { %2138 = vtanh.f32 %v2005_v33  ;;  %v1943_v36 = vpop.f32.mrb[27].mxu0  ;;  %v1718_v41 = vmul.f32 -1.442695, %v2005_v33 }
0x1181   :  { %2140 = vpow2.f32 %v1715_v38 }
0x118a   :  { %v2139_v37 = vpop.eup %2138 }
0x118b   :  { %1252 = vrot.lane.b32.xlu1 %v2139_v37, %s2203_s0  ;;  %v2141_v39 = vpop.eup %2140 }
0x118c   :  { %v1131_v40 = vadd.f32 1.0, %v2141_v39 }
0x118e   :  { %2142 = vrcp.f32 %v1131_v40 }
0x118f   :  { %2144 = vpow2.f32 %v1718_v41 }
0x1198   :  { %v2143_v42 = vpop.eup %2142 }
0x1199   :  { %v2145_v44 = vpop.eup %2144  ;;  %v1138_v49 = vmul.f32 %v2143_v42, %v1136_v25 }
0x119a   :  { %v1246_v23 = vadd.f32 1.0, %v2145_v44 }
0x119c   :  { %2146 = vrcp.f32 %v1246_v23 }
0x11a6   :  { %v2147_v46 = vpop.eup %2146 }
0x11a7   :  { %v1250_v53 = vmul.f32 %v2147_v46, %v2515_v6 }
0x11eb   :  { %v1141_v43 = vpop.permute.xlu0 %1140 }
0x11ec   :  { %v1143_v45 = vmul.f32 %v2143_v42, %v1141_v43 }
0x11ee   :  { %1145 = vrot.lane.b32.xlu0 %v1143_v45, %s2203_s0 }
0x11fd   :  { %v1253_v47 = vpop.permute.xlu1 %1252 }
0x11fe   :  { %v1255_v48 = vmul.f32 %v2147_v46, %v1253_v47 }
0x1200   :  { %1257 = vrot.lane.b32.xlu1 %v1255_v48, %s2203_s0 }
0x1260   :  { %v1146_v50 = vpop.permute.xlu0 %1145 }
0x1261   :  { %v2549_v51 = vadd.f32 %v1146_v50, %v1138_v49  ;;  %v2176_v49 = vld [vmem:[%s2636_s6] ss:$0 sm:$0xff] }
0x1263   :  { %2148 = vtanh.f32 %v2549_v51  ;;  %v1327_v31 = vrot.slane %v2549_v51, 6 }
0x126d   :  { %v2149_v52 = vpop.eup %2148 }
0x126e   :  { %1151 = vrot.lane.b32.xlu0 %v2149_v52, %s2203_s0 }
0x1272   :  { %v1258_v54 = vpop.permute.xlu1 %1257 }
0x1273   :  { %v2554_v55 = vadd.f32 %v1258_v54, %v1250_v53 }
0x1275   :  { %2150 = vtanh.f32 %v2554_v55 }
0x127f   :  { %v2151_v56 = vpop.eup %2150 }
0x1280   :  { %1263 = vrot.lane.b32.xlu1 %v2151_v56, %s2203_s0 }
0x12e0   :  { %v1152_v57 = vpop.permute.xlu0 %1151 }
0x12e1   :  { %v1154_v58 = vmul.f32 %v2143_v42, %v1152_v57 }
0x12e3   :  { %v1267_v59 = vpack.c.bf16 %v1154_v58, %v1154_v58 }
0x12e5   :  { %v1269_v60 = vrot.slane %v1267_v59, 2 }
0x12e7   :  { %1270 = vrot.lane.b32.xlu0 %v1269_v60, %s2204_s2 }
0x12f2   :  { %v1264_v62 = vpop.permute.xlu1 %1263 }
0x12f3   :  { %v1266_v61 = vmul.f32 %v2147_v46, %v1264_v62  ;;  %v1578_v62 = vld [vmem:[%s2637_s7] sm:$0xff] }
0x12f5   :  { %v1386_v63 = vpack.c.bf16 %v1266_v61, %v1266_v61  ;;  %v1579_v61 = vld [vmem:[%s2637_s7 + $0x8] sm:$0xff] }
0x12f7   :  { %1388 = vrot.lane.b32.xlu1 %v1386_v63, %s2204_s2  ;;  %v1580_v63 = vld [vmem:[%s2637_s7 + $0x10] sm:$0xff] }
0x1359   :  { %v1271_v0 = vpop.permute.xlu0 %1270 }
0x135a   :  { %1949 = vmatmul.mubr.msk.bf16.vlgmr.msra.gmra.mrb[24].mxu1 %vm153_vm3, %v1271_v0 }
0x135b   :  { %1953 = vmatpush3.bf16.msra.mxu1 %v2297_v24  ;;  %1956 = vmatprep.mubr.msk.bf16.mxu1 %vm2202_vm1, %v2201_v2 }
0x135c   :  { %1954 = vmatprep.subr.bf16.mxu1 %v2201_v2 }
0x135f   :  { %1955 = vmatpush3.bf16.msra.mxu1 %v2309_v26 }
0x1360   :  { %1960 = vmatprep.subr.bf16.mxu1 %v2201_v2 }
0x1362   :  { %1957 = vmatmul.mubr.msk.bf16.vlgmr.msra.gmra.mrb[28].mxu1 %vm153_vm3, %v1271_v0  ;;  %v2205_v0 = vmov 0.0|0.0  }
0x1363   :  { %1961 = vmatpush3.bf16.msra.mxu1 %v2358_v13  ;;  %1964 = vmatprep.mubr.msk.bf16.mxu1 %vm2202_vm1, %v2201_v2 }
0x1364   :  { %1962 = vmatprep.subr.bf16.mxu1 %v2201_v2 }
0x1367   :  { %1963 = vmatpush3.bf16.msra.mxu1 %v2366_v15 }
0x1368   :  { %1995 = vmatprep.subr.bf16.mxu1 %v2205_v0 }
0x1369   :  { %v1389_v24 = vpop.permute.xlu1 %1388 }
0x136e   :  { %1965 = vmatmul.mubr.msk.bf16.vlgmr.msra.gmra.mrb[28].mxu1 %vm153_vm3, %v1389_v24  ;;  %v1996_v24 = vpack.c.bf16 %v1579_v61, %v1578_v62 }
0x136f   :  { %1992 = vmatprep.mubr.msk.f32.mxu1 %vm2202_vm1, %v2201_v2 }
0x1370   :  { %1997 = vmatpush3.bf16.msra.mxu1 %v1996_v24 }
0x1371   :  { %1998 = vmatprep.subr.bf16.mxu1 %v2205_v0 }
0x142d   :  { %v1309_v26 = vpop.f32.mrb[24].mxu1 }
0x142e   :  { %v1316_v1 = vrot.slane %v1309_v26, 2  ;;  %v1950_v3 = vpop.f32.mrb[25].mxu1  ;;  %v1581_v26 = vld [vmem:[%s2637_s7 + $0x18] sm:$0xff]  ;;  %s1672_s7 = sshll.u32 %s2206_s3, 4  ;;  %s1673_s7 = int_to_ptr.vmem [resolvable:$true] %s1672_s7 }
0x142f   :  { %v1312_v4 = vpop.f32.mrb[26].mxu1  ;;  %p2182_p1 = scmp.lt.s32.totalorder %s1673_s7, %s1673_s7 }
0x1430   :  { %v1318_v5 = vadd.f32 %v1316_v1, %v2280_v11  ;;  %v1951_v6 = vpop.f32.mrb[27].mxu1  ;;  %v1999_v1 = vpack.c.bf16 %v1581_v26, %v1580_v63 }
0x1432   :  { %2152 = vtanh.f32 %v1318_v5  ;;  %v1720_v18 = vmul.f32 -1.442695, %v1318_v5  ;;  %2000 = vmatpush3.bf16.msra.mxu1 %v1999_v1 }
0x143c   :  { %v2153_v7 = vpop.eup %2152 }
0x143d   :  { %1331 = vrot.lane.b32.xlu0 %v2153_v7, %s2203_s0  ;;  %v1727_v7 = vld [vmem:[%s2638_s8] ss:$0 sm:$0xff] }
0x1441   :  { %v1427_v9 = vpop.f32.mrb[28].mxu1 }
0x1442   :  { %v2006_v10 = vadd.f32 %v2336_v32, %v1427_v9  ;;  %v1966_v12 = vpop.f32.mrb[29].mxu1 }
0x1443   :  { %v1430_v14 = vpop.f32.mrb[30].mxu1 }
0x1444   :  { %2154 = vtanh.f32 %v2006_v10  ;;  %v1967_v16 = vpop.f32.mrb[31].mxu1  ;;  %v1723_v11 = vmul.f32 -1.442695, %v2006_v10 }
0x1445   :  { %2156 = vpow2.f32 %v1720_v18 }
0x144e   :  { %v2155_v17 = vpop.eup %2154 }
0x144f   :  { %1443 = vrot.lane.b32.xlu1 %v2155_v17, %s2203_s0  ;;  %v2157_v19 = vpop.eup %2156 }
0x1450   :  { %v1322_v20 = vadd.f32 1.0, %v2157_v19 }
0x1452   :  { %2158 = vrcp.f32 %v1322_v20 }
0x1453   :  { %2160 = vpow2.f32 %v1723_v11 }
0x145c   :  { %v2159_v21 = vpop.eup %2158 }
0x145d   :  { %v2161_v22 = vpop.eup %2160  ;;  %v1329_v33 = vmul.f32 %v2159_v21, %v1327_v31 }
0x145e   :  { %v1437_v32 = vadd.f32 1.0, %v2161_v22 }
0x1460   :  { %2162 = vrcp.f32 %v1437_v32 }
0x146a   :  { %v2163_v28 = vpop.eup %2162 }
0x146b   :  { %v1441_v37 = vmul.f32 %v2163_v28, %v2554_v55 }
0x14af   :  { %v1332_v8 = vpop.permute.xlu0 %1331 }
0x14b0   :  { %v1334_v27 = vmul.f32 %v2159_v21, %v1332_v8 }
0x14b2   :  { %1336 = vrot.lane.b32.xlu0 %v1334_v27, %s2203_s0 }
0x14c1   :  { %v1444_v29 = vpop.permute.xlu1 %1443 }
0x14c2   :  { %v1446_v30 = vmul.f32 %v2163_v28, %v1444_v29 }
0x14c4   :  { %1448 = vrot.lane.b32.xlu1 %v1446_v30, %s2203_s0 }
0x1524   :  { %v1337_v34 = vpop.permute.xlu0 %1336 }
0x1525   :  { %v1339_v35 = vadd.f32 %v1337_v34, %v1329_v33 }
0x1527   :  { %2164 = vtanh.f32 %v1339_v35 }
0x1531   :  { %v2165_v36 = vpop.eup %2164 }
0x1532   :  { %1342 = vrot.lane.b32.xlu0 %v2165_v36, %s2203_s0 }
0x1536   :  { %v1449_v38 = vpop.permute.xlu1 %1448 }
0x1537   :  { %v1451_v39 = vadd.f32 %v1449_v38, %v1441_v37 }
0x1539   :  { %2166 = vtanh.f32 %v1451_v39 }
0x1543   :  { %v2167_v40 = vpop.eup %2166 }
0x1544   :  { %1454 = vrot.lane.b32.xlu1 %v2167_v40, %s2203_s0 }
0x15a4   :  { %v1343_v41 = vpop.permute.xlu0 %1342 }
0x15a5   :  { %v1345_v42 = vmul.f32 %v2159_v21, %v1343_v41 }
0x15a7   :  { %v1458_v43 = vpack.c.bf16 %v1345_v42, %v1345_v42 }
0x15a9   :  { %v1460_v44 = vrot.slane %v1458_v43, 3 }
0x15ab   :  { %1461 = vrot.lane.b32.xlu0 %v1460_v44, %s2204_s2 }
0x15b6   :  { %v1455_v45 = vpop.permute.xlu1 %1454 }
0x15b7   :  { %v1457_v23 = vmul.f32 %v2163_v28, %v1455_v45 }
0x15b9   :  { %v1506_v46 = vpack.c.bf16 %v1457_v23, %v1457_v23 }
0x15bb   :  { %1508 = vrot.lane.b32.xlu1 %v1506_v46, %s2204_s2 }
0x161d   :  { %v1462_v47 = vpop.permute.xlu0 %1461 }
0x161e   :  { %1973 = vmatmul.mubr.msk.bf16.vlgmr.msra.gmra.mrb[28].mxu0 %vm153_vm3, %v1462_v47 }
0x161f   :  { %1977 = vmatpush3.bf16.msra.mxu0 %v2358_v13  ;;  %1980 = vmatprep.mubr.msk.bf16.mxu0 %vm2202_vm1, %v2201_v2 }
0x1620   :  { %1978 = vmatprep.subr.bf16.mxu0 %v2201_v2 }
0x1623   :  { %1979 = vmatpush3.bf16.msra.mxu0 %v2366_v15 }
0x162d   :  { %v1509_v48 = vpop.permute.xlu1 %1508 }
0x162e   :  { %1981 = vmatmul.mubr.msk.bf16.vlgmr.msra.gmra.mrb[28].mxu0 %vm153_vm3, %v1509_v48 }
0x1701   :  { %v1547_v25 = vpop.f32.mrb[28].mxu0 }
0x1702   :  { %v2007_v50 = vadd.f32 %v2176_v49, %v1547_v25  ;;  %v1982_v51 = vpop.f32.mrb[29].mxu0 }
0x1703   :  { %v1550_v52 = vpop.f32.mrb[30].mxu0 }
0x1704   :  { %2168 = vtanh.f32 %v2007_v50  ;;  %v1983_v13 = vpop.f32.mrb[31].mxu0  ;;  %v1726_v54 = vmul.f32 -1.442695, %v2007_v50 }
0x1706   :  { %2170 = vpow2.f32 %v1726_v54 }
0x170e   :  { %v2169_v53 = vpop.eup %2168 }
0x170f   :  { %1563 = vrot.lane.b32.xlu0 %v2169_v53, %s2203_s0 }
0x1710   :  { %v2171_v2 = vpop.eup %2170 }
0x1711   :  { %v1557_v15 = vadd.f32 1.0, %v2171_v2 }
0x1713   :  { %2172 = vrcp.f32 %v1557_v15 }
0x171d   :  { %v2173_v55 = vpop.eup %2172 }
0x171e   :  { %v1561_v58 = vmul.f32 %v2173_v55, %v1451_v39 }
0x1781   :  { %v1564_v56 = vpop.permute.xlu0 %1563 }
0x1782   :  { %v1566_v57 = vmul.f32 %v2173_v55, %v1564_v56 }
0x1784   :  { %1568 = vrot.lane.b32.xlu1 %v1566_v57, %s2203_s0 }
0x17f6   :  { %v1569_v59 = vpop.permute.xlu1 %1568 }
0x17f7   :  { %v1571_v60 = vadd.f32 %v1569_v59, %v1561_v58 }
0x17f9   :  { %2174 = vtanh.f32 %v1571_v60 }
0x1803   :  { %v2175_v3 = vpop.eup %2174 }
0x1804   :  { %1574 = vrot.lane.b32.xlu0 %v2175_v3, %s2203_s0  ;;  %s2177_s0 = scalar_lea.vmem %s1673_s7, 32 }
0x1805   :  { %p2178_p0 = scmp.ne.s32.totalorder %s1673_s7, %s2177_s0  ;;  %p2183_p2 = scmp.lt.s32.totalorder %s2177_s0, %s2177_s0 }
0x1807   :  { %p2184_p3 = por %p2183_p2, %p2182_p1 }
0x1809   :  { %p2185_p4 = pnand %p2184_p3, %p2178_p0 }
0x1876   :  { %v1575_v4 = vpop.permute.xlu0 %1574 }
0x1877   :  { %v1577_v5 = vmul.f32 %v2173_v55, %v1575_v4 }
0x1879   :  { %1590 = vrot.lane.b32.xlu1 %v1577_v5, %s2204_s2 }
0x18eb   :  { %v1591_v6 = vpop.permute.xlu1 %1590 }
0x18ec   :  { %1993 = vmatmul.mubr.msk.f32.vlgmr.msra.gmra.mrb[32].mxu1 %vm153_vm3, %v1591_v6 }
0x19bf   :  { %v1660_v9 = vpop.f32.mrb[32].mxu1 }
0x19c0   :  { %v1661_v10 = vadd.f32 %v1727_v7, %v1660_v9  ;;  %v1994_v12 = vpop.f32.mrb[33].mxu1 }
0x19c2   :  { %1665 = vst.msk [vmem:[#allocation2] sm:$0x3] %vm1664_vm4, %v1661_v10 }
0x19c3   :  { %2188 = shalt.err (!%p2185_p4)
}
0x19c4   :  { %s2189_s18 = scalar_lea.hbm %s2639_s9, 32 }
0x19c5   :  { %p2190_p5 = scmp.ne.s32.totalorder %s2639_s9, %s2189_s18  ;;  %p2193_p6 = scmp.lt.u32.totalorder %s2189_s18, %s2639_s9 }
0x19c7   :  { %p2195_p7 = pnand %p2193_p6, %p2190_p5 }
0x19c9   :  { %2198 = shalt.err (!%p2195_p7)
}
0x19ca   :  { %1675 = dma.vmem_to_hbm [thread:$0]  %s1673_s7, 32, %s2639_s9, [#allocation3]  }
0x19cb   :  { %2199 = dma.done.wait [#allocation3], 32  }
0x19cc   :  { %2200 = vsyncadd [#allocation3], 4294967264 }
0x19cd   :  { %1679 = vsyncpa [#allocation3], 1 }

</bundles_post_ra>
